<compile_context>
chip_gen: v7x
topology: tpu7x:2x2x1
jax: 0.10.0
libtpu: 0.0.40
codegen_flags: <defaults>
</compile_context>

<pallas_src>
import numpy as np
import jax
import jax.numpy as jnp
from jax import lax
from jax.experimental import pallas as pl
from jax.experimental.pallas import tpu as pltpu


# ----------------------------------------------------------------------------
# Fused kernel: conv1 -> pool -> relu -> conv2 -> pool -> relu -> fc1 -> relu
#               -> fc2 -> log_softmax, for one batch tile of B images.
# ----------------------------------------------------------------------------
def _mnist_cnn_kernel(x_ref, w1m_ref, b1r_ref, w2m_ref, b2r_ref,
                      fw1m_ref, fb1r_ref, fw2_ref, fb2r_ref,
                      out_ref, s1, s2):
    B = x_ref.shape[0]

    # ---- conv1: 5 shifted-row matmuls.  Output lanes = (w%2)*120 + (w//2)*10 + c
    acc1 = None
    for ki in range(5):
        slab = x_ref[:, pl.ds(ki, 24), :].reshape(B * 24, 28)          # (B*24, 28)
        t = jnp.dot(slab, w1m_ref[ki], preferred_element_type=jnp.float32)
        acc1 = t if acc1 is None else acc1 + t
    y1 = acc1 + b1r_ref[...]                                           # (B*24, 240)

    # ---- maxpool 2x2, W direction (parity-major lane halves) -------------
    wmax1 = jnp.maximum(y1[:, :120], y1[:, 120:])                      # (B*24, 120)
    s1[...] = wmax1.reshape(B, 24, 120)

    # ---- conv2, fused with pool1 H direction + ReLU -----------------------
    #      pooled row h' = max(rows 2h', 2h'+1); slab for tap ki = rows ki..ki+7
    acc2 = None
    for ki in range(5):
        even = s1[:, pl.ds(2 * ki, 8, 2), :]                           # (B, 8, 120)
        odd = s1[:, pl.ds(2 * ki + 1, 8, 2), :]                        # (B, 8, 120)
        p1_slab = jnp.maximum(jnp.maximum(even, odd), 0.0)             # pool + ReLU
        t = jnp.dot(p1_slab.reshape(B * 8, 120), w2m_ref[ki],
                    preferred_element_type=jnp.float32)
        acc2 = t if acc2 is None else acc2 + t
    y2 = acc2 + b2r_ref[...]                                           # (B*8, 160)
    # TODO(synk): Dropout2d(0.5) is a no-op (inference semantics).

    # ---- maxpool 2x2 on conv2 output: W direction now, H direction below --
    s2[...] = jnp.maximum(y2[:, :80], y2[:, 80:])                      # (B*8, 80)

    # ---- fc1, fused with pool2 H direction + ReLU; NCHW flatten folded ----
    acc3 = None
    for h in range(4):
        even = s2[pl.ds(2 * h, B, 8), :]                               # (B, 80)
        odd = s2[pl.ds(2 * h + 1, B, 8), :]                            # (B, 80)
        p2_h = jnp.maximum(jnp.maximum(even, odd), 0.0)                # pool + ReLU
        t = jnp.dot(p2_h, fw1m_ref[h], preferred_element_type=jnp.float32)
        acc3 = t if acc3 is None else acc3 + t
    h1 = jnp.maximum(acc3 + fb1r_ref[...], 0.0)                        # (B, 50)
    # TODO(synk): Dropout(0.5) is a no-op (inference semantics).

    # ---- fc2 + numerically stable log_softmax -----------------------------
    z = jnp.dot(h1, fw2_ref[...], preferred_element_type=jnp.float32) + fb2r_ref[...]
    m = jnp.max(z, axis=1, keepdims=True)
    lse = m + jnp.log(jnp.sum(jnp.exp(z - m), axis=1, keepdims=True))
    out_ref[...] = z - lse


def _pick_batch_tile(n):
    for b in (64, 32, 16, 8):
        if n % b == 0:
            return b
    return n  # small / awkward batch: single grid step


def mnist_cnn_forward(x_nchw, packed):
    """x_nchw: (N, 1, 28, 28) float32 -> (N, 10) log-probs."""
    w1m, b1r, w2m, b2r, fw1m, fb1r, fw2m, fb2r = packed
    N = x_nchw.shape[0]
    assert x_nchw.shape[1:] == (1, 28, 28)
    x = x_nchw.reshape(N, 28, 28).astype(jnp.float32)   # Cin == 1: pure reshape
    B = _pick_batch_tile(N)
    grid = (N // B,)

    return pl.pallas_call(
        _mnist_cnn_kernel,
        out_shape=jax.ShapeDtypeStruct((N, 10), jnp.float32),
        grid=grid,
        in_specs=[
            pl.BlockSpec((B, 28, 28), lambda i: (i, 0, 0)),     # images (batch tile)
            pl.BlockSpec((5, 28, 240), lambda i: (0, 0, 0)),    # conv1 tap matrices
            pl.BlockSpec((1, 240), lambda i: (0, 0)),           # conv1 bias row
            pl.BlockSpec((5, 120, 160), lambda i: (0, 0, 0)),   # conv2 tap matrices
            pl.BlockSpec((1, 160), lambda i: (0, 0)),           # conv2 bias row
            pl.BlockSpec((4, 80, 50), lambda i: (0, 0, 0)),     # fc1 (flatten folded)
            pl.BlockSpec((1, 50), lambda i: (0, 0)),            # fc1 bias row
            pl.BlockSpec((50, 10), lambda i: (0, 0)),           # fc2 weight
            pl.BlockSpec((1, 10), lambda i: (0, 0)),            # fc2 bias row
        ],
        out_specs=pl.BlockSpec((B, 10), lambda i: (i, 0)),
        scratch_shapes=[
            pltpu.VMEM((B, 24, 120), jnp.float32),              # conv1 W-pooled map
            pltpu.VMEM((B * 8, 80), jnp.float32),               # conv2 W-pooled map
        ],
        compiler_params=pltpu.CompilerParams(
            dimension_semantics=("parallel",)),
    )(x, w1m, b1r, w2m, b2r, fw1m, fb1r, fw2m, fb2r)


# ----------------------------------------------------------------------------
# Parameters (PyTorch layout, deterministic default-style uniform init)
# ----------------------------------------------------------------------------
def init_params(key):
    def u(k, shape, fan_in):
        bound = 1.0 / np.sqrt(fan_in)
        return jax.random.uniform(k, shape, jnp.float32, -bound, bound)

    ks = jax.random.split(key, 8)
    return {
        "conv1_w": u(ks[0], (10, 1, 5, 5), 25),
        "conv1_b": u(ks[1], (10,), 25),
        "conv2_w": u(ks[2], (20, 10, 5, 5), 250),
        "conv2_b": u(ks[3], (20,), 250),
        "fc1_w": u(ks[4], (50, 320), 320),
        "fc1_b": u(ks[5], (50,), 320),
        "fc2_w": u(ks[6], (10, 50), 50),
        "fc2_b": u(ks[7], (10,), 50),
    }


def pack_params(p):
    """Host-side (one time): fold conv taps / pooling lane order / NCHW flatten
    into dense matmul operands for the fused kernel."""
    w1 = np.asarray(p["conv1_w"], np.float32)   # (10, 1, 5, 5)
    b1 = np.asarray(p["conv1_b"], np.float32)
    w2 = np.asarray(p["conv2_w"], np.float32)   # (20, 10, 5, 5)
    b2 = np.asarray(p["conv2_b"], np.float32)
    fw1 = np.asarray(p["fc1_w"], np.float32)    # (50, 320)
    fb1 = np.asarray(p["fc1_b"], np.float32)
    fw2 = np.asarray(p["fc2_w"], np.float32)    # (10, 50)
    fb2 = np.asarray(p["fc2_b"], np.float32)

    # conv1: output lane = (w % 2)*120 + (w // 2)*10 + c, w in 0..23, c in 0..9
    w1m = np.zeros((5, 28, 240), np.float32)
    b1r = np.zeros((1, 240), np.float32)
    for s in range(12):
        for par in range(2):
            w = 2 * s + par
            lane0 = par * 120 + s * 10
            b1r[0, lane0:lane0 + 10] = b1
            for ki in range(5):
                for kj in range(5):
                    w1m[ki, w + kj, lane0:lane0 + 10] = w1[:, 0, ki, kj]

    # conv2: input lane = w_in*10 + c1 (w_in 0..11); output lane = (w%2)*80 + (w//2)*20 + c2
    w2m = np.zeros((5, 120, 160), np.float32)
    b2r = np.zeros((1, 160), np.float32)
    for s in range(4):
        for par in range(2):
            w = 2 * s + par
            lane0 = par * 80 + s * 20
            b2r[0, lane0:lane0 + 20] = b2
            for ki in range(5):
                for kj in range(5):
                    j = w + kj
                    w2m[ki, j * 10:j * 10 + 10, lane0:lane0 + 20] = w2[:, :, ki, kj].T

    # fc1: per-h tap matrices; lane of pooled map = w*20 + c; torch flat idx = c*16 + h*4 + w
    fw1m = np.zeros((4, 80, 50), np.float32)
    for h in range(4):
        for w in range(4):
            cols = [c * 16 + h * 4 + w for c in range(20)]
            fw1m[h, w * 20:w * 20 + 20, :] = fw1[:, cols].T
    fb1r = fb1.reshape(1, 50)
    fw2m = np.ascontiguousarray(fw2.T)          # (50, 10)
    fb2r = fb2.reshape(1, 10)

    return tuple(jnp.asarray(a) for a in
                 (w1m, b1r, w2m, b2r, fw1m, fb1r, fw2m, fb2r))


# ----------------------------------------------------------------------------
# Pure-JAX reference (matches the PyTorch module, eval mode)
# ----------------------------------------------------------------------------
def reference_forward(params, x_nchw):
    x = x_nchw.astype(jnp.float32)
    dn = ("NCHW", "OIHW", "NCHW")
    y = lax.conv_general_dilated(x, params["conv1_w"], (1, 1), "VALID",
                                 dimension_numbers=dn)
    y = y + params["conv1_b"][None, :, None, None]
    y = lax.reduce_window(y, -jnp.inf, lax.max, (1, 1, 2, 2), (1, 1, 2, 2), "VALID")
    y = jnp.maximum(y, 0.0)
    y = lax.conv_general_dilated(y, params["conv2_w"], (1, 1), "VALID",
                                 dimension_numbers=dn)
    y = y + params["conv2_b"][None, :, None, None]
    y = lax.reduce_window(y, -jnp.inf, lax.max, (1, 1, 2, 2), (1, 1, 2, 2), "VALID")
    y = jnp.maximum(y, 0.0)
    flat = y.reshape(y.shape[0], 320)
    h = jnp.maximum(flat @ params["fc1_w"].T + params["fc1_b"], 0.0)
    z = h @ params["fc2_w"].T + params["fc2_b"]
    return jax.nn.log_softmax(z, axis=1)


if __name__ == "__main__":
    key = jax.random.PRNGKey(0)
    k_param, k_x = jax.random.split(key)
    params = init_params(k_param)
    packed = pack_params(params)
    x = jax.random.normal(k_x, (2, 1, 28, 28), dtype=jnp.float32)  # NCHW like PyTorch

    fwd = jax.jit(mnist_cnn_forward)
    out = jax.block_until_ready(fwd(x, packed))
    assert out.shape == (2, 10)

    ref = jax.block_until_ready(jax.jit(reference_forward)(params, x))
    out_np, ref_np = np.asarray(out), np.asarray(ref)
    assert np.allclose(out_np, ref_np, atol=2e-4, rtol=2e-4), \
        float(np.max(np.abs(out_np - ref_np)))
    assert np.allclose(np.exp(out_np).sum(axis=1), 1.0, atol=1e-4)
    print("KERNEL_OK")
</pallas_src>

<mosaic_0001>
module attributes {stable_mosaic.version = 11 : i64} {
  func.func @_mnist_cnn_kernel(%arg0: i32, %arg1: memref<2x28x28xf32, #tpu.memory_space<vmem>>, %arg2: memref<5x28x240xf32, #tpu.memory_space<vmem>>, %arg3: memref<1x240xf32, #tpu.memory_space<vmem>>, %arg4: memref<5x120x160xf32, #tpu.memory_space<vmem>>, %arg5: memref<1x160xf32, #tpu.memory_space<vmem>>, %arg6: memref<4x80x50xf32, #tpu.memory_space<vmem>>, %arg7: memref<1x50xf32, #tpu.memory_space<vmem>>, %arg8: memref<50x10xf32, #tpu.memory_space<vmem>>, %arg9: memref<1x10xf32, #tpu.memory_space<vmem>>, %arg10: memref<2x10xf32, #tpu.memory_space<vmem>>, %arg11: memref<2x24x120xf32, #tpu.memory_space<vmem>>, %arg12: memref<16x80xf32, #tpu.memory_space<vmem>>) attributes {dimension_semantics = [#tpu.dimension_semantics<parallel>], iteration_bounds = array<i64: 1>, scalar_prefetch = 0 : i64, scratch_operands = 2 : i64, tpu.core_type = #tpu.core_type<tc>, window_params = [{transform_indices = @transform_0, window_bounds = array<i64: 2, 28, 28>}, {pipeline_mode = #tpu.pipeline_mode<synchronous>, transform_indices = @transform_1, window_bounds = array<i64: 5, 28, 240>}, {pipeline_mode = #tpu.pipeline_mode<synchronous>, transform_indices = @transform_2, window_bounds = array<i64: 1, 240>}, {pipeline_mode = #tpu.pipeline_mode<synchronous>, transform_indices = @transform_3, window_bounds = array<i64: 5, 120, 160>}, {pipeline_mode = #tpu.pipeline_mode<synchronous>, transform_indices = @transform_4, window_bounds = array<i64: 1, 160>}, {pipeline_mode = #tpu.pipeline_mode<synchronous>, transform_indices = @transform_5, window_bounds = array<i64: 4, 80, 50>}, {pipeline_mode = #tpu.pipeline_mode<synchronous>, transform_indices = @transform_6, window_bounds = array<i64: 1, 50>}, {pipeline_mode = #tpu.pipeline_mode<synchronous>, transform_indices = @transform_7, window_bounds = array<i64: 50, 10>}, {pipeline_mode = #tpu.pipeline_mode<synchronous>, transform_indices = @transform_8, window_bounds = array<i64: 1, 10>}, {transform_indices = @transform_9, window_bounds = array<i64: 2, 10>}]} {
    %c0 = arith.constant 0 : index
    %c0_0 = arith.constant 0 : index
    %c0_1 = arith.constant 0 : index
    %0 = vector.load %arg1[%c0, %c0_0, %c0_1] : memref<2x28x28xf32, #tpu.memory_space<vmem>>, vector<2x24x28xf32>
    %1 = vector.shape_cast %0 : vector<2x24x28xf32> to vector<48x28xf32>
    %c0_2 = arith.constant 0 : index
    %c0_3 = arith.constant 0 : index
    %c0_4 = arith.constant 0 : index
    %2 = vector.load %arg2[%c0_2, %c0_3, %c0_4] : memref<5x28x240xf32, #tpu.memory_space<vmem>>, vector<1x28x240xf32>
    %3 = vector.shape_cast %2 : vector<1x28x240xf32> to vector<28x240xf32>
    %cst = arith.constant dense<0.000000e+00> : vector<48x240xf32>
    %4 = tpu.matmul %1, %3, %cst {dimension_numbers = #tpu.dot_dimension_numbers<[1], [0], [0], [1], [0, 0, 1, 1], [], []>} : vector<48x28xf32>, vector<28x240xf32>, vector<48x240xf32> -> vector<48x240xf32>
    %c0_5 = arith.constant 0 : index
    %c1 = arith.constant 1 : index
    %c0_6 = arith.constant 0 : index
    %5 = vector.load %arg1[%c0_5, %c1, %c0_6] : memref<2x28x28xf32, #tpu.memory_space<vmem>>, vector<2x24x28xf32>
    %6 = vector.shape_cast %5 : vector<2x24x28xf32> to vector<48x28xf32>
    %c1_7 = arith.constant 1 : index
    %c0_8 = arith.constant 0 : index
    %c0_9 = arith.constant 0 : index
    %7 = vector.load %arg2[%c1_7, %c0_8, %c0_9] : memref<5x28x240xf32, #tpu.memory_space<vmem>>, vector<1x28x240xf32>
    %8 = vector.shape_cast %7 : vector<1x28x240xf32> to vector<28x240xf32>
    %cst_10 = arith.constant dense<0.000000e+00> : vector<48x240xf32>
    %9 = tpu.matmul %6, %8, %cst_10 {dimension_numbers = #tpu.dot_dimension_numbers<[1], [0], [0], [1], [0, 0, 1, 1], [], []>} : vector<48x28xf32>, vector<28x240xf32>, vector<48x240xf32> -> vector<48x240xf32>
    %10 = arith.addf %4, %9 : vector<48x240xf32>
    %c0_11 = arith.constant 0 : index
    %c2 = arith.constant 2 : index
    %c0_12 = arith.constant 0 : index
    %11 = vector.load %arg1[%c0_11, %c2, %c0_12] : memref<2x28x28xf32, #tpu.memory_space<vmem>>, vector<2x24x28xf32>
    %12 = vector.shape_cast %11 : vector<2x24x28xf32> to vector<48x28xf32>
    %c2_13 = arith.constant 2 : index
    %c0_14 = arith.constant 0 : index
    %c0_15 = arith.constant 0 : index
    %13 = vector.load %arg2[%c2_13, %c0_14, %c0_15] : memref<5x28x240xf32, #tpu.memory_space<vmem>>, vector<1x28x240xf32>
    %14 = vector.shape_cast %13 : vector<1x28x240xf32> to vector<28x240xf32>
    %cst_16 = arith.constant dense<0.000000e+00> : vector<48x240xf32>
    %15 = tpu.matmul %12, %14, %cst_16 {dimension_numbers = #tpu.dot_dimension_numbers<[1], [0], [0], [1], [0, 0, 1, 1], [], []>} : vector<48x28xf32>, vector<28x240xf32>, vector<48x240xf32> -> vector<48x240xf32>
    %16 = arith.addf %10, %15 : vector<48x240xf32>
    %c0_17 = arith.constant 0 : index
    %c3 = arith.constant 3 : index
    %c0_18 = arith.constant 0 : index
    %17 = vector.load %arg1[%c0_17, %c3, %c0_18] : memref<2x28x28xf32, #tpu.memory_space<vmem>>, vector<2x24x28xf32>
    %18 = vector.shape_cast %17 : vector<2x24x28xf32> to vector<48x28xf32>
    %c3_19 = arith.constant 3 : index
    %c0_20 = arith.constant 0 : index
    %c0_21 = arith.constant 0 : index
    %19 = vector.load %arg2[%c3_19, %c0_20, %c0_21] : memref<5x28x240xf32, #tpu.memory_space<vmem>>, vector<1x28x240xf32>
    %20 = vector.shape_cast %19 : vector<1x28x240xf32> to vector<28x240xf32>
    %cst_22 = arith.constant dense<0.000000e+00> : vector<48x240xf32>
    %21 = tpu.matmul %18, %20, %cst_22 {dimension_numbers = #tpu.dot_dimension_numbers<[1], [0], [0], [1], [0, 0, 1, 1], [], []>} : vector<48x28xf32>, vector<28x240xf32>, vector<48x240xf32> -> vector<48x240xf32>
    %22 = arith.addf %16, %21 : vector<48x240xf32>
    %c0_23 = arith.constant 0 : index
    %c4 = arith.constant 4 : index
    %c0_24 = arith.constant 0 : index
    %23 = vector.load %arg1[%c0_23, %c4, %c0_24] : memref<2x28x28xf32, #tpu.memory_space<vmem>>, vector<2x24x28xf32>
    %24 = vector.shape_cast %23 : vector<2x24x28xf32> to vector<48x28xf32>
    %c4_25 = arith.constant 4 : index
    %c0_26 = arith.constant 0 : index
    %c0_27 = arith.constant 0 : index
    %25 = vector.load %arg2[%c4_25, %c0_26, %c0_27] : memref<5x28x240xf32, #tpu.memory_space<vmem>>, vector<1x28x240xf32>
    %26 = vector.shape_cast %25 : vector<1x28x240xf32> to vector<28x240xf32>
    %cst_28 = arith.constant dense<0.000000e+00> : vector<48x240xf32>
    %27 = tpu.matmul %24, %26, %cst_28 {dimension_numbers = #tpu.dot_dimension_numbers<[1], [0], [0], [1], [0, 0, 1, 1], [], []>} : vector<48x28xf32>, vector<28x240xf32>, vector<48x240xf32> -> vector<48x240xf32>
    %28 = arith.addf %22, %27 : vector<48x240xf32>
    %c0_29 = arith.constant 0 : index
    %c0_30 = arith.constant 0 : index
    %29 = vector.load %arg3[%c0_29, %c0_30] : memref<1x240xf32, #tpu.memory_space<vmem>>, vector<1x240xf32>
    %30 = vector.broadcast %29 : vector<1x240xf32> to vector<48x240xf32>
    %31 = arith.addf %28, %30 : vector<48x240xf32>
    %32 = vector.extract_strided_slice %31 {offsets = [0, 0], sizes = [48, 120], strides = [1, 1]} : vector<48x240xf32> to vector<48x120xf32>
    %33 = vector.extract_strided_slice %31 {offsets = [0, 120], sizes = [48, 120], strides = [1, 1]} : vector<48x240xf32> to vector<48x120xf32>
    %34 = arith.maximumf %32, %33 : vector<48x120xf32>
    %35 = vector.shape_cast %34 : vector<48x120xf32> to vector<2x24x120xf32>
    %c0_31 = arith.constant 0 : index
    %c0_32 = arith.constant 0 : index
    %c0_33 = arith.constant 0 : index
    %36 = vector.load %arg11[%c0_31, %c0_32, %c0_33] : memref<2x24x120xf32, #tpu.memory_space<vmem>>, vector<2x24x120xf32>
    tpu.vector_store %arg11[%c0_31, %c0_32, %c0_33], %35 {strides = array<i32>} : memref<2x24x120xf32, #tpu.memory_space<vmem>>, vector<2x24x120xf32>,
    %c0_34 = arith.constant 0 : index
    %c0_35 = arith.constant 0 : index
    %c0_36 = arith.constant 0 : index
    %37 = tpu.strided_load %arg11[%c0_34, %c0_35, %c0_36] {strides = array<i32: 1, 2, 1>} : memref<2x24x120xf32, #tpu.memory_space<vmem>>, vector<2x8x120xf32>
    %c0_37 = arith.constant 0 : index
    %c1_38 = arith.constant 1 : index
    %c0_39 = arith.constant 0 : index
    %38 = tpu.strided_load %arg11[%c0_37, %c1_38, %c0_39] {strides = array<i32: 1, 2, 1>} : memref<2x24x120xf32, #tpu.memory_space<vmem>>, vector<2x8x120xf32>
    %39 = arith.maximumf %37, %38 : vector<2x8x120xf32>
    %cst_40 = arith.constant 0.000000e+00 : f32
    %40 = vector.broadcast %cst_40 : f32 to vector<2x8x120xf32>
    %41 = arith.maximumf %39, %40 : vector<2x8x120xf32>
    %42 = vector.shape_cast %41 : vector<2x8x120xf32> to vector<16x120xf32>
    %c0_41 = arith.constant 0 : index
    %c0_42 = arith.constant 0 : index
    %c0_43 = arith.constant 0 : index
    %43 = vector.load %arg4[%c0_41, %c0_42, %c0_43] : memref<5x120x160xf32, #tpu.memory_space<vmem>>, vector<1x120x160xf32>
    %44 = vector.shape_cast %43 : vector<1x120x160xf32> to vector<120x160xf32>
    %cst_44 = arith.constant dense<0.000000e+00> : vector<16x160xf32>
    %45 = tpu.matmul %42, %44, %cst_44 {dimension_numbers = #tpu.dot_dimension_numbers<[1], [0], [0], [1], [0, 0, 1, 1], [], []>} : vector<16x120xf32>, vector<120x160xf32>, vector<16x160xf32> -> vector<16x160xf32>
    %c0_45 = arith.constant 0 : index
    %c2_46 = arith.constant 2 : index
    %c0_47 = arith.constant 0 : index
    %46 = tpu.strided_load %arg11[%c0_45, %c2_46, %c0_47] {strides = array<i32: 1, 2, 1>} : memref<2x24x120xf32, #tpu.memory_space<vmem>>, vector<2x8x120xf32>
    %c0_48 = arith.constant 0 : index
    %c3_49 = arith.constant 3 : index
    %c0_50 = arith.constant 0 : index
    %47 = tpu.strided_load %arg11[%c0_48, %c3_49, %c0_50] {strides = array<i32: 1, 2, 1>} : memref<2x24x120xf32, #tpu.memory_space<vmem>>, vector<2x8x120xf32>
    %48 = arith.maximumf %46, %47 : vector<2x8x120xf32>
    %cst_51 = arith.constant 0.000000e+00 : f32
    %49 = vector.broadcast %cst_51 : f32 to vector<2x8x120xf32>
    %50 = arith.maximumf %48, %49 : vector<2x8x120xf32>
    %51 = vector.shape_cast %50 : vector<2x8x120xf32> to vector<16x120xf32>
    %c1_52 = arith.constant 1 : index
    %c0_53 = arith.constant 0 : index
    %c0_54 = arith.constant 0 : index
    %52 = vector.load %arg4[%c1_52, %c0_53, %c0_54] : memref<5x120x160xf32, #tpu.memory_space<vmem>>, vector<1x120x160xf32>
    %53 = vector.shape_cast %52 : vector<1x120x160xf32> to vector<120x160xf32>
    %cst_55 = arith.constant dense<0.000000e+00> : vector<16x160xf32>
    %54 = tpu.matmul %51, %53, %cst_55 {dimension_numbers = #tpu.dot_dimension_numbers<[1], [0], [0], [1], [0, 0, 1, 1], [], []>} : vector<16x120xf32>, vector<120x160xf32>, vector<16x160xf32> -> vector<16x160xf32>
    %55 = arith.addf %45, %54 : vector<16x160xf32>
    %c0_56 = arith.constant 0 : index
    %c4_57 = arith.constant 4 : index
    %c0_58 = arith.constant 0 : index
    %56 = tpu.strided_load %arg11[%c0_56, %c4_57, %c0_58] {strides = array<i32: 1, 2, 1>} : memref<2x24x120xf32, #tpu.memory_space<vmem>>, vector<2x8x120xf32>
    %c0_59 = arith.constant 0 : index
    %c5 = arith.constant 5 : index
    %c0_60 = arith.constant 0 : index
    %57 = tpu.strided_load %arg11[%c0_59, %c5, %c0_60] {strides = array<i32: 1, 2, 1>} : memref<2x24x120xf32, #tpu.memory_space<vmem>>, vector<2x8x120xf32>
    %58 = arith.maximumf %56, %57 : vector<2x8x120xf32>
    %cst_61 = arith.constant 0.000000e+00 : f32
    %59 = vector.broadcast %cst_61 : f32 to vector<2x8x120xf32>
    %60 = arith.maximumf %58, %59 : vector<2x8x120xf32>
    %61 = vector.shape_cast %60 : vector<2x8x120xf32> to vector<16x120xf32>
    %c2_62 = arith.constant 2 : index
    %c0_63 = arith.constant 0 : index
    %c0_64 = arith.constant 0 : index
    %62 = vector.load %arg4[%c2_62, %c0_63, %c0_64] : memref<5x120x160xf32, #tpu.memory_space<vmem>>, vector<1x120x160xf32>
    %63 = vector.shape_cast %62 : vector<1x120x160xf32> to vector<120x160xf32>
    %cst_65 = arith.constant dense<0.000000e+00> : vector<16x160xf32>
    %64 = tpu.matmul %61, %63, %cst_65 {dimension_numbers = #tpu.dot_dimension_numbers<[1], [0], [0], [1], [0, 0, 1, 1], [], []>} : vector<16x120xf32>, vector<120x160xf32>, vector<16x160xf32> -> vector<16x160xf32>
    %65 = arith.addf %55, %64 : vector<16x160xf32>
    %c0_66 = arith.constant 0 : index
    %c6 = arith.constant 6 : index
    %c0_67 = arith.constant 0 : index
    %66 = tpu.strided_load %arg11[%c0_66, %c6, %c0_67] {strides = array<i32: 1, 2, 1>} : memref<2x24x120xf32, #tpu.memory_space<vmem>>, vector<2x8x120xf32>
    %c0_68 = arith.constant 0 : index
    %c7 = arith.constant 7 : index
    %c0_69 = arith.constant 0 : index
    %67 = tpu.strided_load %arg11[%c0_68, %c7, %c0_69] {strides = array<i32: 1, 2, 1>} : memref<2x24x120xf32, #tpu.memory_space<vmem>>, vector<2x8x120xf32>
    %68 = arith.maximumf %66, %67 : vector<2x8x120xf32>
    %cst_70 = arith.constant 0.000000e+00 : f32
    %69 = vector.broadcast %cst_70 : f32 to vector<2x8x120xf32>
    %70 = arith.maximumf %68, %69 : vector<2x8x120xf32>
    %71 = vector.shape_cast %70 : vector<2x8x120xf32> to vector<16x120xf32>
    %c3_71 = arith.constant 3 : index
    %c0_72 = arith.constant 0 : index
    %c0_73 = arith.constant 0 : index
    %72 = vector.load %arg4[%c3_71, %c0_72, %c0_73] : memref<5x120x160xf32, #tpu.memory_space<vmem>>, vector<1x120x160xf32>
    %73 = vector.shape_cast %72 : vector<1x120x160xf32> to vector<120x160xf32>
    %cst_74 = arith.constant dense<0.000000e+00> : vector<16x160xf32>
    %74 = tpu.matmul %71, %73, %cst_74 {dimension_numbers = #tpu.dot_dimension_numbers<[1], [0], [0], [1], [0, 0, 1, 1], [], []>} : vector<16x120xf32>, vector<120x160xf32>, vector<16x160xf32> -> vector<16x160xf32>
    %75 = arith.addf %65, %74 : vector<16x160xf32>
    %c0_75 = arith.constant 0 : index
    %c8 = arith.constant 8 : index
    %c0_76 = arith.constant 0 : index
    %76 = tpu.strided_load %arg11[%c0_75, %c8, %c0_76] {strides = array<i32: 1, 2, 1>} : memref<2x24x120xf32, #tpu.memory_space<vmem>>, vector<2x8x120xf32>
    %c0_77 = arith.constant 0 : index
    %c9 = arith.constant 9 : index
    %c0_78 = arith.constant 0 : index
    %77 = tpu.strided_load %arg11[%c0_77, %c9, %c0_78] {strides = array<i32: 1, 2, 1>} : memref<2x24x120xf32, #tpu.memory_space<vmem>>, vector<2x8x120xf32>
    %78 = arith.maximumf %76, %77 : vector<2x8x120xf32>
    %cst_79 = arith.constant 0.000000e+00 : f32
    %79 = vector.broadcast %cst_79 : f32 to vector<2x8x120xf32>
    %80 = arith.maximumf %78, %79 : vector<2x8x120xf32>
    %81 = vector.shape_cast %80 : vector<2x8x120xf32> to vector<16x120xf32>
    %c4_80 = arith.constant 4 : index
    %c0_81 = arith.constant 0 : index
    %c0_82 = arith.constant 0 : index
    %82 = vector.load %arg4[%c4_80, %c0_81, %c0_82] : memref<5x120x160xf32, #tpu.memory_space<vmem>>, vector<1x120x160xf32>
    %83 = vector.shape_cast %82 : vector<1x120x160xf32> to vector<120x160xf32>
    %cst_83 = arith.constant dense<0.000000e+00> : vector<16x160xf32>
    %84 = tpu.matmul %81, %83, %cst_83 {dimension_numbers = #tpu.dot_dimension_numbers<[1], [0], [0], [1], [0, 0, 1, 1], [], []>} : vector<16x120xf32>, vector<120x160xf32>, vector<16x160xf32> -> vector<16x160xf32>
    %85 = arith.addf %75, %84 : vector<16x160xf32>
    %c0_84 = arith.constant 0 : index
    %c0_85 = arith.constant 0 : index
    %86 = vector.load %arg5[%c0_84, %c0_85] : memref<1x160xf32, #tpu.memory_space<vmem>>, vector<1x160xf32>
    %87 = vector.broadcast %86 : vector<1x160xf32> to vector<16x160xf32>
    %88 = arith.addf %85, %87 : vector<16x160xf32>
    %89 = vector.extract_strided_slice %88 {offsets = [0, 0], sizes = [16, 80], strides = [1, 1]} : vector<16x160xf32> to vector<16x80xf32>
    %90 = vector.extract_strided_slice %88 {offsets = [0, 80], sizes = [16, 80], strides = [1, 1]} : vector<16x160xf32> to vector<16x80xf32>
    %91 = arith.maximumf %89, %90 : vector<16x80xf32>
    %c0_86 = arith.constant 0 : index
    %c0_87 = arith.constant 0 : index
    %92 = vector.load %arg12[%c0_86, %c0_87] : memref<16x80xf32, #tpu.memory_space<vmem>>, vector<16x80xf32>
    tpu.vector_store %arg12[%c0_86, %c0_87], %91 {strides = array<i32>} : memref<16x80xf32, #tpu.memory_space<vmem>>, vector<16x80xf32>,
    %c0_88 = arith.constant 0 : index
    %c0_89 = arith.constant 0 : index
    %93 = tpu.strided_load %arg12[%c0_88, %c0_89] {strides = array<i32: 8, 1>} : memref<16x80xf32, #tpu.memory_space<vmem>>, vector<2x80xf32>
    %c1_90 = arith.constant 1 : index
    %c0_91 = arith.constant 0 : index
    %94 = tpu.strided_load %arg12[%c1_90, %c0_91] {strides = array<i32: 8, 1>} : memref<16x80xf32, #tpu.memory_space<vmem>>, vector<2x80xf32>
    %95 = arith.maximumf %93, %94 : vector<2x80xf32>
    %cst_92 = arith.constant 0.000000e+00 : f32
    %96 = vector.broadcast %cst_92 : f32 to vector<2x80xf32>
    %97 = arith.maximumf %95, %96 : vector<2x80xf32>
    %c0_93 = arith.constant 0 : index
    %c0_94 = arith.constant 0 : index
    %c0_95 = arith.constant 0 : index
    %98 = vector.load %arg6[%c0_93, %c0_94, %c0_95] : memref<4x80x50xf32, #tpu.memory_space<vmem>>, vector<1x80x50xf32>
    %99 = vector.shape_cast %98 : vector<1x80x50xf32> to vector<80x50xf32>
    %cst_96 = arith.constant dense<0.000000e+00> : vector<2x50xf32>
    %100 = tpu.matmul %97, %99, %cst_96 {dimension_numbers = #tpu.dot_dimension_numbers<[1], [0], [0], [1], [0, 0, 1, 1], [], []>} : vector<2x80xf32>, vector<80x50xf32>, vector<2x50xf32> -> vector<2x50xf32>
    %c2_97 = arith.constant 2 : index
    %c0_98 = arith.constant 0 : index
    %101 = tpu.strided_load %arg12[%c2_97, %c0_98] {strides = array<i32: 8, 1>} : memref<16x80xf32, #tpu.memory_space<vmem>>, vector<2x80xf32>
    %c3_99 = arith.constant 3 : index
    %c0_100 = arith.constant 0 : index
    %102 = tpu.strided_load %arg12[%c3_99, %c0_100] {strides = array<i32: 8, 1>} : memref<16x80xf32, #tpu.memory_space<vmem>>, vector<2x80xf32>
    %103 = arith.maximumf %101, %102 : vector<2x80xf32>
    %cst_101 = arith.constant 0.000000e+00 : f32
    %104 = vector.broadcast %cst_101 : f32 to vector<2x80xf32>
    %105 = arith.maximumf %103, %104 : vector<2x80xf32>
    %c1_102 = arith.constant 1 : index
    %c0_103 = arith.constant 0 : index
    %c0_104 = arith.constant 0 : index
    %106 = vector.load %arg6[%c1_102, %c0_103, %c0_104] : memref<4x80x50xf32, #tpu.memory_space<vmem>>, vector<1x80x50xf32>
    %107 = vector.shape_cast %106 : vector<1x80x50xf32> to vector<80x50xf32>
    %cst_105 = arith.constant dense<0.000000e+00> : vector<2x50xf32>
    %108 = tpu.matmul %105, %107, %cst_105 {dimension_numbers = #tpu.dot_dimension_numbers<[1], [0], [0], [1], [0, 0, 1, 1], [], []>} : vector<2x80xf32>, vector<80x50xf32>, vector<2x50xf32> -> vector<2x50xf32>
    %109 = arith.addf %100, %108 : vector<2x50xf32>
    %c4_106 = arith.constant 4 : index
    %c0_107 = arith.constant 0 : index
    %110 = tpu.strided_load %arg12[%c4_106, %c0_107] {strides = array<i32: 8, 1>} : memref<16x80xf32, #tpu.memory_space<vmem>>, vector<2x80xf32>
    %c5_108 = arith.constant 5 : index
    %c0_109 = arith.constant 0 : index
    %111 = tpu.strided_load %arg12[%c5_108, %c0_109] {strides = array<i32: 8, 1>} : memref<16x80xf32, #tpu.memory_space<vmem>>, vector<2x80xf32>
    %112 = arith.maximumf %110, %111 : vector<2x80xf32>
    %cst_110 = arith.constant 0.000000e+00 : f32
    %113 = vector.broadcast %cst_110 : f32 to vector<2x80xf32>
    %114 = arith.maximumf %112, %113 : vector<2x80xf32>
    %c2_111 = arith.constant 2 : index
    %c0_112 = arith.constant 0 : index
    %c0_113 = arith.constant 0 : index
    %115 = vector.load %arg6[%c2_111, %c0_112, %c0_113] : memref<4x80x50xf32, #tpu.memory_space<vmem>>, vector<1x80x50xf32>
    %116 = vector.shape_cast %115 : vector<1x80x50xf32> to vector<80x50xf32>
    %cst_114 = arith.constant dense<0.000000e+00> : vector<2x50xf32>
    %117 = tpu.matmul %114, %116, %cst_114 {dimension_numbers = #tpu.dot_dimension_numbers<[1], [0], [0], [1], [0, 0, 1, 1], [], []>} : vector<2x80xf32>, vector<80x50xf32>, vector<2x50xf32> -> vector<2x50xf32>
    %118 = arith.addf %109, %117 : vector<2x50xf32>
    %c6_115 = arith.constant 6 : index
    %c0_116 = arith.constant 0 : index
    %119 = tpu.strided_load %arg12[%c6_115, %c0_116] {strides = array<i32: 8, 1>} : memref<16x80xf32, #tpu.memory_space<vmem>>, vector<2x80xf32>
    %c7_117 = arith.constant 7 : index
    %c0_118 = arith.constant 0 : index
    %120 = tpu.strided_load %arg12[%c7_117, %c0_118] {strides = array<i32: 8, 1>} : memref<16x80xf32, #tpu.memory_space<vmem>>, vector<2x80xf32>
    %121 = arith.maximumf %119, %120 : vector<2x80xf32>
    %cst_119 = arith.constant 0.000000e+00 : f32
    %122 = vector.broadcast %cst_119 : f32 to vector<2x80xf32>
    %123 = arith.maximumf %121, %122 : vector<2x80xf32>
    %c3_120 = arith.constant 3 : index
    %c0_121 = arith.constant 0 : index
    %c0_122 = arith.constant 0 : index
    %124 = vector.load %arg6[%c3_120, %c0_121, %c0_122] : memref<4x80x50xf32, #tpu.memory_space<vmem>>, vector<1x80x50xf32>
    %125 = vector.shape_cast %124 : vector<1x80x50xf32> to vector<80x50xf32>
    %cst_123 = arith.constant dense<0.000000e+00> : vector<2x50xf32>
    %126 = tpu.matmul %123, %125, %cst_123 {dimension_numbers = #tpu.dot_dimension_numbers<[1], [0], [0], [1], [0, 0, 1, 1], [], []>} : vector<2x80xf32>, vector<80x50xf32>, vector<2x50xf32> -> vector<2x50xf32>
    %127 = arith.addf %118, %126 : vector<2x50xf32>
    %c0_124 = arith.constant 0 : index
    %c0_125 = arith.constant 0 : index
    %128 = vector.load %arg7[%c0_124, %c0_125] : memref<1x50xf32, #tpu.memory_space<vmem>>, vector<1x50xf32>
    %129 = vector.broadcast %128 : vector<1x50xf32> to vector<2x50xf32>
    %130 = arith.addf %127, %129 : vector<2x50xf32>
    %cst_126 = arith.constant 0.000000e+00 : f32
    %131 = vector.broadcast %cst_126 : f32 to vector<2x50xf32>
    %132 = arith.maximumf %130, %131 : vector<2x50xf32>
    %c0_127 = arith.constant 0 : index
    %c0_128 = arith.constant 0 : index
    %133 = vector.load %arg8[%c0_127, %c0_128] : memref<50x10xf32, #tpu.memory_space<vmem>>, vector<50x10xf32>
    %cst_129 = arith.constant dense<0.000000e+00> : vector<2x10xf32>
    %134 = tpu.matmul %132, %133, %cst_129 {dimension_numbers = #tpu.dot_dimension_numbers<[1], [0], [0], [1], [0, 0, 1, 1], [], []>} : vector<2x50xf32>, vector<50x10xf32>, vector<2x10xf32> -> vector<2x10xf32>
    %c0_130 = arith.constant 0 : index
    %c0_131 = arith.constant 0 : index
    %135 = vector.load %arg9[%c0_130, %c0_131] : memref<1x10xf32, #tpu.memory_space<vmem>>, vector<1x10xf32>
    %136 = vector.broadcast %135 : vector<1x10xf32> to vector<2x10xf32>
    %137 = arith.addf %134, %136 : vector<2x10xf32>
    %cst_132 = arith.constant dense<0xFF800000> : vector<2xf32>
    %138 = vector.multi_reduction <maximumf>, %137, %cst_132 [1] : vector<2x10xf32> to vector<2xf32>
    %139 = vector.shape_cast %138 : vector<2xf32> to vector<2x1xf32>
    %140 = vector.broadcast %139 : vector<2x1xf32> to vector<2x10xf32>
    %141 = arith.subf %137, %140 : vector<2x10xf32>
    %142 = math.exp %141 : vector<2x10xf32>
    %cst_133 = arith.constant dense<0.000000e+00> : vector<2xf32>
    %143 = vector.multi_reduction <add>, %142, %cst_133 [1] : vector<2x10xf32> to vector<2xf32>
    %144 = vector.shape_cast %143 : vector<2xf32> to vector<2x1xf32>
    %145 = math.log %144 : vector<2x1xf32>
    %146 = arith.addf %139, %145 : vector<2x1xf32>
    %147 = vector.broadcast %146 : vector<2x1xf32> to vector<2x10xf32>
    %148 = arith.subf %137, %147 : vector<2x10xf32>
    %c0_134 = arith.constant 0 : index
    %c0_135 = arith.constant 0 : index
    %149 = vector.load %arg10[%c0_134, %c0_135] : memref<2x10xf32, #tpu.memory_space<vmem>>, vector<2x10xf32>
    tpu.vector_store %arg10[%c0_134, %c0_135], %148 {strides = array<i32>} : memref<2x10xf32, #tpu.memory_space<vmem>>, vector<2x10xf32>,
    return
  }
  func.func @transform_0(%arg0: i32) -> (i32, i32, i32) {
    %c0_i32 = arith.constant 0 : i32
    %c0_i32_0 = arith.constant 0 : i32
    %c0_i32_1 = arith.constant 0 : i32
    return %arg0, %c0_i32, %c0_i32_0 : i32, i32, i32
  }
  func.func @transform_1(%arg0: i32) -> (i32, i32, i32) {
    %c0_i32 = arith.constant 0 : i32
    %c0_i32_0 = arith.constant 0 : i32
    %c0_i32_1 = arith.constant 0 : i32
    %c0_i32_2 = arith.constant 0 : i32
    return %c0_i32, %c0_i32_0, %c0_i32_1 : i32, i32, i32
  }
  func.func @transform_2(%arg0: i32) -> (i32, i32) {
    %c0_i32 = arith.constant 0 : i32
    %c0_i32_0 = arith.constant 0 : i32
    %c0_i32_1 = arith.constant 0 : i32
    return %c0_i32, %c0_i32_0 : i32, i32
  }
  func.func @transform_3(%arg0: i32) -> (i32, i32, i32) {
    %c0_i32 = arith.constant 0 : i32
    %c0_i32_0 = arith.constant 0 : i32
    %c0_i32_1 = arith.constant 0 : i32
    %c0_i32_2 = arith.constant 0 : i32
    return %c0_i32, %c0_i32_0, %c0_i32_1 : i32, i32, i32
  }
  func.func @transform_4(%arg0: i32) -> (i32, i32) {
    %c0_i32 = arith.constant 0 : i32
    %c0_i32_0 = arith.constant 0 : i32
    %c0_i32_1 = arith.constant 0 : i32
    return %c0_i32, %c0_i32_0 : i32, i32
  }
  func.func @transform_5(%arg0: i32) -> (i32, i32, i32) {
    %c0_i32 = arith.constant 0 : i32
    %c0_i32_0 = arith.constant 0 : i32
    %c0_i32_1 = arith.constant 0 : i32
    %c0_i32_2 = arith.constant 0 : i32
    return %c0_i32, %c0_i32_0, %c0_i32_1 : i32, i32, i32
  }
  func.func @transform_6(%arg0: i32) -> (i32, i32) {
    %c0_i32 = arith.constant 0 : i32
    %c0_i32_0 = arith.constant 0 : i32
    %c0_i32_1 = arith.constant 0 : i32
    return %c0_i32, %c0_i32_0 : i32, i32
  }
  func.func @transform_7(%arg0: i32) -> (i32, i32) {
    %c0_i32 = arith.constant 0 : i32
    %c0_i32_0 = arith.constant 0 : i32
    %c0_i32_1 = arith.constant 0 : i32
    return %c0_i32, %c0_i32_0 : i32, i32
  }
  func.func @transform_8(%arg0: i32) -> (i32, i32) {
    %c0_i32 = arith.constant 0 : i32
    %c0_i32_0 = arith.constant 0 : i32
    %c0_i32_1 = arith.constant 0 : i32
    return %c0_i32, %c0_i32_0 : i32, i32
  }
  func.func @transform_9(%arg0: i32) -> (i32, i32) {
    %c0_i32 = arith.constant 0 : i32
    %c0_i32_0 = arith.constant 0 : i32
    return %arg0, %c0_i32 : i32, i32
  }
}

</mosaic_0001>

<bundles_post_ra>
// kernel: mnist_cnn_forward.1
= control target key start
LH: loop header
LB: loop body
LE: loop exit
PB: predicated region body
PF: predicated region fallthrough
CT: control target
= control target key end

     0   :  { %vm81_vm0 = vcmask 1043456   ;;  %v2783_v7 = vmov 0.0   ;;  %vm2784_vm1 = vmmov 1   ;;  %vm62_vm3 = vcmask 228352   ;;  %s3896_s0 = inlined_call_operand.vmem [shape: f32[2,28,28], index: 0, kind: input, shape index: {}]   ;;  %s3897_s1 = inlined_call_operand.vmem [shape: f32[5,28,240], index: 1, kind: input, shape index: {}]   ;;  %s3898_s2 = inlined_call_operand.vmem [shape: f32[1,240], index: 2, kind: input, shape index: {}]   ;;  %s3899_s3 = inlined_call_operand.vmem [shape: f32[5,120,160], index: 3, kind: input, shape index: {}]   ;;  %s3900_s4 = inlined_call_operand.vmem [shape: f32[1,160], index: 4, kind: input, shape index: {}]   ;;  %s3901_s5 = inlined_call_operand.vmem [shape: f32[4,80,50], index: 5, kind: input, shape index: {}]   ;;  %s3902_s6 = inlined_call_operand.vmem [shape: f32[1,50], index: 6, kind: input, shape index: {}]   ;;  %s3903_s7 = inlined_call_operand.vmem [shape: f32[50,10], index: 7, kind: input, shape index: {}]   ;;  %s3904_s8 = inlined_call_operand.vmem [shape: f32[1,10], index: 8, kind: input, shape index: {}]   ;;  %s3905_s9 = inlined_call_operand.hbm [shape: f32[2,10], index: 9, kind: output, shape index: {}]  }
   0x1   :  { %v40_v0 = vld [vmem:[%s3897_s1 + $0x8] sm:$0xff]  ;;  %v42_v1 = vld [vmem:[%s3897_s1 + $0x18] sm:$0xff]  ;;  %v39_v2 = vld [vmem:[%s3897_s1] sm:$0xff]  ;;  %277 = vmatprep.mubr.f32.mxu0 %v2783_v7  ;;  %152 = vmatprep.mubr.f32.mxu1 %v2783_v7 }
   0x2   :  { %v2435_v3 = vpack.c.bf16 %v42_v1, %v40_v0  ;;  %v41_v4 = vld [vmem:[%s3897_s1 + $0x10] sm:$0xff]  ;;  %v44_v5 = vld [vmem:[%s3897_s1 + $0x28] sm:$0xff]  ;;  %v46_v6 = vld [vmem:[%s3897_s1 + $0x38] sm:$0xf] }
   0x3   :  { %v2437_v8 = vpack.c.bf16 %v41_v4, %v39_v2  ;;  %vm2860_vm2 = vmpackc.low %vm81_vm0, %vm2784_vm1  ;;  %v2439_v10 = vpack.c.bf16 %v46_v6, %v44_v5  ;;  %v43_v11 = vld [vmem:[%s3897_s1 + $0x20] sm:$0xff]  ;;  %v45_v12 = vld [vmem:[%s3897_s1 + $0x30] sm:$0xf] }
   0x4   :  { %2436 = vmatprep.subr.bf16.mxu0 %v2435_v3  ;;  %v2049_v13 = vld [vmem:[%s3897_s1 + $0x88] sm:$0xff]  ;;  %v2051_v14 = vld [vmem:[%s3897_s1 + $0x98] sm:$0xff]  ;;  %v2442_v15 = vpack.c.bf16 %v45_v12, %v43_v11  ;;  %v2048_v17 = vld [vmem:[%s3897_s1 + $0x80] sm:$0xff] }
   0x5   :  { %2438 = vmatpush1.bf16.msra.mxu0 %v2437_v8  ;;  %v2445_v16 = vpack.c.bf16 %v2051_v14, %v2049_v13  ;;  %v2050_v18 = vld [vmem:[%s3897_s1 + $0x90] sm:$0xff]  ;;  %v2053_v19 = vld [vmem:[%s3897_s1 + $0xa8] sm:$0xff]  ;;  %v2055_v20 = vld [vmem:[%s3897_s1 + $0xb8] sm:$0xf] }
   0x6   :  { %2441 = vmatprep.subr.msk.bf16.mxu0 %vm2860_vm2, %v2439_v10  ;;  %v33_v21 = vld [vmem:[%s3896_s0] sm:$0xff]  ;;  %v2447_v22 = vpack.c.bf16 %v2050_v18, %v2048_v17  ;;  %v2449_v23 = vpack.c.bf16 %v2055_v20, %v2053_v19  ;;  %v2054_v25 = vld [vmem:[%s3897_s1 + $0xb0] sm:$0xf]  ;;  %v2065_v26 = vld [vmem:[%s3897_s1 + $0xc8] sm:$0xff] }
   0x7   :  { %v2052_v24 = vld [vmem:[%s3897_s1 + $0xa0] sm:$0xff]  ;;  %v2067_v27 = vld [vmem:[%s3897_s1 + $0xd8] sm:$0xff]  ;;  %v34_v28 = vld [vmem:[%s3896_s0 + $0x8] sm:$0xff] }
   0x8   :  { %v2452_v29 = vpack.c.bf16 %v2054_v25, %v2052_v24  ;;  %v2455_v30 = vpack.c.bf16 %v2067_v27, %v2065_v26  ;;  %v35_v31 = vld [vmem:[%s3896_s0 + $0x10] sm:$0xff]  ;;  %v2025_v32 = vld [vmem:[%s3897_s1 + $0x48] sm:$0xff]  ;;  %v2027_v33 = vld [vmem:[%s3897_s1 + $0x58] sm:$0xff] }
   0x9   :  { %2444 = vmatpush1.bf16.msk.msra.mxu0 %vm2860_vm2, %v2442_v15  ;;  %v2425_v34 = vpack.c.bf16 %v2027_v33, %v2025_v32  ;;  %v2024_v35 = vld [vmem:[%s3897_s1 + $0x40] sm:$0xff]  ;;  %v2026_v36 = vld [vmem:[%s3897_s1 + $0x50] sm:$0xff]  ;;  %v2029_v38 = vld [vmem:[%s3897_s1 + $0x68] sm:$0xff] }
   0xa   :  { %2446 = vmatprep.subr.bf16.mxu0 %v2445_v16  ;;  %v2427_v37 = vpack.c.bf16 %v2026_v36, %v2024_v35  ;;  %v2031_v39 = vld [vmem:[%s3897_s1 + $0x78] sm:$0xf]  ;;  %v2028_v41 = vld [vmem:[%s3897_s1 + $0x60] sm:$0xff]  ;;  %v2030_v42 = vld [vmem:[%s3897_s1 + $0x70] sm:$0xf] }
   0xb   :  { %2426 = vmatprep.subr.bf16.mxu1 %v2425_v34  ;;  %v2429_v40 = vpack.c.bf16 %v2031_v39, %v2029_v38  ;;  %v36_v43 = vld [vmem:[%s3896_s0 + $0x20] sm:$0xff]  ;;  %v2432_v44 = vpack.c.bf16 %v2030_v42, %v2028_v41 }
   0xc   :  { %2042 = vmatmul.mubr.msk.f32.vlgmr.msra.gmra.mrb[0].mxu0 %vm62_vm3, %v33_v21  ;;  %2428 = vmatpush1.bf16.msra.mxu1 %v2427_v37 }
   0xd   :  { %2448 = vmatpush1.bf16.msra.mxu0 %v2447_v22  ;;  %283 = vmatprep.mubr.f32.mxu0 %v2783_v7 }
   0xe   :  { %2451 = vmatprep.subr.msk.bf16.mxu0 %vm2860_vm2, %v2449_v23  ;;  %2431 = vmatprep.subr.msk.bf16.mxu1 %vm2860_vm2, %v2429_v40 }
  0x10   :  { %2043 = vmatmul.mubr.msk.f32.gmra.mrb[2].mxu0 %vm62_vm3, %v34_v28 }
  0x11   :  { %289 = vmatprep.mubr.f32.mxu0 %v2783_v7  ;;  %2454 = vmatpush1.bf16.msk.msra.mxu0 %vm2860_vm2, %v2452_v29 }
  0x12   :  { %2456 = vmatprep.subr.bf16.mxu0 %v2455_v30 }
  0x14   :  { %2044 = vmatmul.mubr.msk.f32.gmra.mrb[4].mxu0 %vm62_vm3, %v35_v31 }
  0x15   :  { %295 = vmatprep.mubr.f32.mxu0 %v2783_v7 }
  0x18   :  { %2045 = vmatmul.mubr.msk.f32.gmra.mrb[6].mxu0 %vm62_vm3, %v36_v43 }
  0x19   :  { %14 = vsyncpa [#allocation5], 0  ;;  %301 = vmatprep.mubr.f32.mxu0 %v2783_v7  ;;  %v37_v45 = vld [vmem:[%s3896_s0 + $0x28] sm:$0xff]  ;;  %2434 = vmatpush1.bf16.msk.msra.mxu1 %vm2860_vm2, %v2432_v44  ;;  %v38_v47 = vld [vmem:[%s3896_s0 + $0x30] sm:$0xff]  ;;  %s2785_s17 = smov 8   ;;  %vm830_vm4 = vcmask 64512  }
  0x1a   :  { %v47_v46 = vld [vmem:[%s3896_s0 + $0x1] sm:$0xff]  ;;  %v48_v48 = vld [vmem:[%s3896_s0 + $0x9] sm:$0xff]  ;;  %v2071_v52 = vld [vmem:[%s3897_s1 + $0xf8] sm:$0xf]  ;;  %vm849_vm5 = vcmask 982016   ;;  %vm2787_vm6 = vmmov 0  }
  0x1b   :  { %v2064_v49 = vld [vmem:[%s3897_s1 + $0xc0] sm:$0xff]  ;;  %v2066_v50 = vld [vmem:[%s3897_s1 + $0xd0] sm:$0xff]  ;;  %v2069_v51 = vld [vmem:[%s3897_s1 + $0xe8] sm:$0xff]  ;;  %s2788_s28 = smov 48   ;;  %vm1524_vm7 = vcmask 392192   ;;  %vm1531_vm8 = vcmask 654336  }
  0x1c   :  { %2046 = vmatmul.mubr.msk.f32.gmra.mrb[8].mxu0 %vm62_vm3, %v37_v45  ;;  %2034 = vmatmul.mubr.msk.f32.vlgmr.msra.gmra.mrb[0].mxu1 %vm62_vm3, %v47_v46  ;;  %v314_v53 = vld [vmem:[%s3896_s0 + $0x2] sm:$0xff]  ;;  %v2457_v54 = vpack.c.bf16 %v2066_v50, %v2064_v49  ;;  %v49_v55 = vld [vmem:[%s3896_s0 + $0x11] sm:$0xff]  ;;  %v2459_v56 = vpack.c.bf16 %v2071_v52, %v2069_v51  ;;  %vm1921_vm9 = vcmask 1041408   ;;  %vm1917_vm10 = vcmask 408576  }
  0x1d   :  { %307 = vmatprep.mubr.f32.mxu0 %v2783_v7  ;;  %158 = vmatprep.mubr.f32.mxu1 %v2783_v7  ;;  %v2068_v57 = vld [vmem:[%s3897_s1 + $0xe0] sm:$0xff]  ;;  %v2070_v58 = vld [vmem:[%s3897_s1 + $0xf0] sm:$0xf]  ;;  %v2081_v59 = vld [vmem:[%s3897_s1 + $0x108] sm:$0xff]  ;;  %vm1995_vm11 = vcmask 74752  }
  0x1e   :  { %v2083_v60 = vld [vmem:[%s3897_s1 + $0x118] sm:$0xff]  ;;  %v315_v61 = vld [vmem:[%s3896_s0 + $0xa] sm:$0xff]  ;;  %v2462_v62 = vpack.c.bf16 %v2070_v58, %v2068_v57  ;;  %v50_v63 = vld [vmem:[%s3896_s0 + $0x21] sm:$0xff] }
  0x1f   :  { %v2465_v0 = vpack.c.bf16 %v2083_v60, %v2081_v59  ;;  %v316_v1 = vld [vmem:[%s3896_s0 + $0x12] sm:$0xff]  ;;  %v51_v2 = vld [vmem:[%s3896_s0 + $0x29] sm:$0xff]  ;;  %v2080_v8 = vld [vmem:[%s3897_s1 + $0x100] sm:$0xff] }
  0x20   :  { %2047 = vmatmul.mubr.msk.f32.gmra.mrb[10].mxu0 %vm62_vm3, %v38_v47  ;;  %2035 = vmatmul.mubr.msk.f32.gmra.mrb[2].mxu1 %vm62_vm3, %v48_v48  ;;  %v317_v3 = vld [vmem:[%s3896_s0 + $0x22] sm:$0xff]  ;;  %v52_v4 = vld [vmem:[%s3896_s0 + $0x31] sm:$0xff]  ;;  %v772_v47 = vlaneseq }
  0x21   :  { %417 = vmatprep.mubr.f32.mxu0 %v2783_v7  ;;  %164 = vmatprep.mubr.f32.mxu1 %v2783_v7  ;;  %v318_v5 = vld [vmem:[%s3896_s0 + $0x2a] sm:$0xff]  ;;  %v319_v6 = vld [vmem:[%s3896_s0 + $0x32] sm:$0xff]  ;;  %v2084_v16 = vld [vmem:[%s3897_s1 + $0x120] sm:$0xff] }
  0x22   :  { %v2082_v10 = vld [vmem:[%s3897_s1 + $0x110] sm:$0xff]  ;;  %v2085_v11 = vld [vmem:[%s3897_s1 + $0x128] sm:$0xff]  ;;  %v2087_v12 = vld [vmem:[%s3897_s1 + $0x138] sm:$0xf] }
  0x23   :  { %v466_v13 = vld [vmem:[%s3896_s0 + $0x3] sm:$0xff]  ;;  %v2467_v14 = vpack.c.bf16 %v2082_v10, %v2080_v8  ;;  %v2469_v15 = vpack.c.bf16 %v2087_v12, %v2085_v11  ;;  %v2086_v17 = vld [vmem:[%s3897_s1 + $0x130] sm:$0xf]  ;;  %v620_v25 = vld [vmem:[%s3896_s0 + $0x14] sm:$0xff] }
  0x24   :  { %2058 = vmatmul.mubr.msk.f32.vlgmr.msra.gmra.mrb[0].mxu0 %vm62_vm3, %v314_v53  ;;  %2036 = vmatmul.mubr.msk.f32.gmra.mrb[4].mxu1 %vm62_vm3, %v49_v55  ;;  %v467_v18 = vld [vmem:[%s3896_s0 + $0xb] sm:$0xff]  ;;  %v2472_v19 = vpack.c.bf16 %v2086_v17, %v2084_v16  ;;  %v468_v20 = vld [vmem:[%s3896_s0 + $0x13] sm:$0xff]  ;;  %v469_v21 = vld [vmem:[%s3896_s0 + $0x23] sm:$0xff]  ;;  %v3175_v53 = vshrl.u32 %v772_v47, 7 }
  0x25   :  { %2458 = vmatpush1.bf16.msra.mxu0 %v2457_v54  ;;  %423 = vmatprep.mubr.f32.mxu0 %v2783_v7  ;;  %v470_v22 = vld [vmem:[%s3896_s0 + $0x2b] sm:$0xff]  ;;  %v471_v9 = vld [vmem:[%s3896_s0 + $0x33] sm:$0xff]  ;;  %v2098_v33 = vld [vmem:[%s3899_s3 + $0x100] sm:$0xff] }
  0x26   :  { %2461 = vmatprep.subr.msk.bf16.mxu0 %vm2860_vm2, %v2459_v56  ;;  %170 = vmatprep.mubr.f32.mxu1 %v2783_v7  ;;  %v618_v23 = vld [vmem:[%s3896_s0 + $0x4] sm:$0xff]  ;;  %v619_v24 = vld [vmem:[%s3896_s0 + $0xc] sm:$0xff]  ;;  %v623_v28 = vld [vmem:[%s3896_s0 + $0x34] sm:$0xff]  ;;  %v774_v60 = vsub.s32 0, %v3175_v53 }
  0x27   :  { %v621_v26 = vld [vmem:[%s3896_s0 + $0x24] sm:$0xff]  ;;  %v622_v27 = vld [vmem:[%s3896_s0 + $0x2c] sm:$0xff]  ;;  %v2097_v29 = vld [vmem:[%s3899_s3 + $0xf8] sm:$0xff] }
  0x28   :  { %2059 = vmatmul.mubr.msk.f32.gmra.mrb[2].mxu0 %vm62_vm3, %v315_v61  ;;  %2037 = vmatmul.mubr.msk.f32.gmra.mrb[6].mxu1 %vm62_vm3, %v50_v63  ;;  %v2099_v30 = vld [vmem:[%s3899_s3 + $0x108] sm:$0xff]  ;;  %v2096_v31 = vld [vmem:[%s3899_s3 + $0xf0] sm:$0xff]  ;;  %v2101_v48 = vld [vmem:[%s3899_s3 + $0x118] sm:$0xff] }
  0x29   :  { %429 = vmatprep.mubr.f32.mxu0 %v2783_v7  ;;  %2464 = vmatpush1.bf16.msk.msra.mxu0 %vm2860_vm2, %v2462_v62  ;;  %v2475_v32 = vpack.c.bf16 %v2099_v30, %v2097_v29  ;;  %v2477_v34 = vpack.c.bf16 %v2098_v33, %v2096_v31  ;;  %v2103_v49 = vld [vmem:[%s3899_s3 + $0x128] sm:$0xff]  ;;  %v2100_v51 = vld [vmem:[%s3899_s3 + $0x110] sm:$0xff]  ;;  %v2102_v52 = vld [vmem:[%s3899_s3 + $0x120] sm:$0xff] }
  0x2a   :  { %2466 = vmatprep.subr.bf16.mxu0 %v2465_v0  ;;  %176 = vmatprep.mubr.f32.mxu1 %v2783_v7  ;;  %v2479_v50 = vpack.c.bf16 %v2103_v49, %v2101_v48  ;;  %v2481_v54 = vpack.c.bf16 %v2102_v52, %v2100_v51  ;;  %v2105_v55 = vld [vmem:[%s3899_s3 + $0x138] sm:$0xff]  ;;  %v2107_v56 = vld [vmem:[%s3899_s3 + $0x148] sm:$0xff]  ;;  %v2104_v58 = vld [vmem:[%s3899_s3 + $0x130] sm:$0xff] }
  0x2b   :  { %2476 = vmatprep.subr.bf16.mxu1 %v2475_v32  ;;  %v2483_v57 = vpack.c.bf16 %v2107_v56, %v2105_v55  ;;  %v2106_v59 = vld [vmem:[%s3899_s3 + $0x140] sm:$0xff]  ;;  %v2109_v63 = vld [vmem:[%s3899_s3 + $0x158] sm:$0xff]  ;;  %v2111_v0 = vld [vmem:[%s3899_s3 + $0x168] sm:$0xff] }
  0x2c   :  { %2060 = vmatmul.mubr.msk.f32.gmra.mrb[4].mxu0 %vm62_vm3, %v316_v1  ;;  %2038 = vmatmul.mubr.msk.f32.gmra.mrb[8].mxu1 %vm62_vm3, %v51_v2  ;;  %v2485_v61 = vpack.c.bf16 %v2106_v59, %v2104_v58  ;;  %v770_v62 = vld [vmem:[%s3898_s2] sm:$0x3]  ;;  %v2487_v1 = vpack.c.bf16 %v2111_v0, %v2109_v63  ;;  %v2108_v2 = vld [vmem:[%s3899_s3 + $0x150] sm:$0xff]  ;;  %v2113_v12 = vld [vmem:[%s3899_s3 + $0x178] sm:$0xff] }
  0x2d   :  { %435 = vmatprep.mubr.f32.mxu0 %v2783_v7  ;;  %182 = vmatprep.mubr.f32.mxu1 %v2783_v7  ;;  %v2112_v16 = vld [vmem:[%s3899_s3 + $0x170] sm:$0xff]  ;;  %v2114_v17 = vld [vmem:[%s3899_s3 + $0x180] sm:$0xff]  ;;  %v870_v58 = vld [vmem:[%s3899_s3 + $0x18] sm:$0xff] }
  0x2e   :  { %2478 = vmatpush1.bf16.msra.mxu1 %v2477_v34  ;;  %v2122_v47 = vld [vmem:[%s3899_s3 + $0x1c0] sm:$0xff] }
  0x2f   :  { %2480 = vmatprep.subr.bf16.mxu1 %v2479_v50 }
  0x30   :  { %2061 = vmatmul.mubr.msk.f32.gmra.mrb[6].mxu0 %vm62_vm3, %v317_v3  ;;  %2039 = vmatmul.mubr.msk.f32.gmra.mrb[10].mxu1 %vm62_vm3, %v52_v4  ;;  %v2110_v3 = vld [vmem:[%s3899_s3 + $0x160] sm:$0xff]  ;;  %v778_v4 = vsub.s32 1, %v3175_v53  ;;  %v2256_v53 = vld [vmem:[%s3901_s5 + $0x128] sm:$0xff] }
  0x31   :  { %441 = vmatprep.mubr.f32.mxu0 %v2783_v7  ;;  %1010 = vmatprep.mubr.f32.mxu1 %v2783_v7 }
  0x32   :  { %2482 = vmatpush1.bf16.msra.mxu1 %v2481_v54 }
  0x33   :  { %2484 = vmatprep.subr.bf16.mxu1 %v2483_v57  ;;  %v2125_v57 = vld [vmem:[%s3899_s3 + $0x1d8] sm:$0xff] }
  0x34   :  { %2062 = vmatmul.mubr.msk.f32.gmra.mrb[8].mxu0 %vm62_vm3, %v318_v5  ;;  %v3208_v5 = vrot.slane %v770_v62, %v774_v60 }
  0x35   :  { %447 = vmatprep.mubr.f32.mxu0 %v2783_v7 }
  0x36   :  { %2486 = vmatpush1.bf16.msra.mxu1 %v2485_v61 }
  0x37   :  { %2488 = vmatprep.subr.bf16.mxu1 %v2487_v1 }
  0x38   :  { %2063 = vmatmul.mubr.msk.f32.gmra.mrb[10].mxu0 %vm62_vm3, %v319_v6  ;;  %v2489_v6 = vpack.c.bf16 %v2110_v3, %v2108_v2 }
  0x39   :  { %569 = vmatprep.mubr.f32.mxu0 %v2783_v7 }
  0x3a   :  { %2490 = vmatpush1.bf16.msra.mxu1 %v2489_v6 }
  0x3c   :  { %2074 = vmatmul.mubr.msk.f32.vlgmr.msra.gmra.mrb[0].mxu0 %vm62_vm3, %v466_v13  ;;  %v2115_v13 = vld [vmem:[%s3899_s3 + $0x188] sm:$0xff] }
  0x3d   :  { %2468 = vmatpush1.bf16.msra.mxu0 %v2467_v14  ;;  %575 = vmatprep.mubr.f32.mxu0 %v2783_v7 }
  0x3e   :  { %2471 = vmatprep.subr.msk.bf16.mxu0 %vm2860_vm2, %v2469_v15  ;;  %v2491_v15 = vpack.c.bf16 %v2115_v13, %v2113_v12 }
  0x40   :  { %2075 = vmatmul.mubr.msk.f32.gmra.mrb[2].mxu0 %vm62_vm3, %v467_v18  ;;  %v3224_v18 = vrot.slane %v770_v62, %v778_v4  ;;  %2492 = vmatprep.subr.bf16.mxu1 %v2491_v15 }
  0x41   :  { %581 = vmatprep.mubr.f32.mxu0 %v2783_v7  ;;  %2474 = vmatpush1.bf16.msk.msra.mxu0 %vm2860_vm2, %v2472_v19 }
  0x44   :  { %2076 = vmatmul.mubr.msk.f32.gmra.mrb[4].mxu0 %vm62_vm3, %v468_v20  ;;  %v2493_v20 = vpack.c.bf16 %v2114_v17, %v2112_v16 }
  0x45   :  { %587 = vmatprep.mubr.f32.mxu0 %v2783_v7 }
  0x46   :  { %2494 = vmatpush1.bf16.msra.mxu1 %v2493_v20 }
  0x48   :  { %2077 = vmatmul.mubr.msk.f32.gmra.mrb[6].mxu0 %vm62_vm3, %v469_v21 }
  0x49   :  { %593 = vmatprep.mubr.f32.mxu0 %v2783_v7 }
  0x4c   :  { %2078 = vmatmul.mubr.msk.f32.gmra.mrb[8].mxu0 %vm62_vm3, %v470_v22 }
  0x4d   :  { %599 = vmatprep.mubr.f32.mxu0 %v2783_v7 }
  0x50   :  { %2079 = vmatmul.mubr.msk.f32.gmra.mrb[10].mxu0 %vm62_vm3, %v471_v9 }
  0x51   :  { %721 = vmatprep.mubr.f32.mxu0 %v2783_v7 }
  0x54   :  { %2090 = vmatmul.mubr.msk.f32.vlgmr.msra.gmra.mrb[0].mxu0 %vm62_vm3, %v618_v23  ;;  %v2117_v23 = vld [vmem:[%s3899_s3 + $0x198] sm:$0xff] }
  0x55   :  { %727 = vmatprep.mubr.f32.mxu0 %v2783_v7 }
  0x58   :  { %2091 = vmatmul.mubr.msk.f32.gmra.mrb[2].mxu0 %vm62_vm3, %v619_v24  ;;  %v2119_v24 = vld [vmem:[%s3899_s3 + $0x1a8] sm:$0xff] }
  0x59   :  { %733 = vmatprep.mubr.f32.mxu0 %v2783_v7 }
  0x5c   :  { %2092 = vmatmul.mubr.msk.f32.gmra.mrb[4].mxu0 %vm62_vm3, %v620_v25 }
  0x5d   :  { %739 = vmatprep.mubr.f32.mxu0 %v2783_v7 }
  0x60   :  { %2093 = vmatmul.mubr.msk.f32.gmra.mrb[6].mxu0 %vm62_vm3, %v621_v26  ;;  %v2495_v26 = vpack.c.bf16 %v2119_v24, %v2117_v23 }
  0x61   :  { %745 = vmatprep.mubr.f32.mxu0 %v2783_v7 }
  0x62   :  { %2496 = vmatprep.subr.bf16.mxu1 %v2495_v26 }
  0x64   :  { %2094 = vmatmul.mubr.msk.f32.gmra.mrb[8].mxu0 %vm62_vm3, %v622_v27  ;;  %v2116_v27 = vld [vmem:[%s3899_s3 + $0x190] sm:$0xff] }
  0x65   :  { %751 = vmatprep.mubr.f32.mxu0 %v2783_v7 }
  0x68   :  { %2095 = vmatmul.mubr.msk.f32.gmra.mrb[10].mxu0 %vm62_vm3, %v623_v28  ;;  %v2118_v28 = vld [vmem:[%s3899_s3 + $0x1a0] sm:$0xff] }
  0x69   :  { %v2497_v31 = vpack.c.bf16 %v2118_v28, %v2116_v27  ;;  %v867_v28 = vld [vmem:[%s3899_s3] sm:$0xff]  ;;  %2336 = vmatprep.mubr.msk.f32.mxu0 %vm2787_vm6, %v2783_v7 }
  0x6b   :  { %2498 = vmatpush1.bf16.msra.mxu1 %v2497_v31 }
  0xef   :  { %v154_v35 = vpop.f32.mrb[0].mxu1 }
  0xf0   :  { %v156_v36 = vpop.f32.mrb[1].mxu1 }
  0xf3   :  { %v160_v37 = vpop.f32.mrb[2].mxu1 }
  0xf4   :  { %v162_v38 = vpop.f32.mrb[3].mxu1 }
  0xf7   :  { %v3147_v39 = vpop.f32.mrb[4].mxu1 }
  0xf8   :  { %v3149_v40 = vpop.f32.mrb[5].mxu1 }
  0xfb   :  { %v3151_v41 = vpop.f32.mrb[6].mxu1 }
  0xfc   :  { %v3153_v42 = vpop.f32.mrb[7].mxu1 }
  0xff   :  { %v3155_v43 = vpop.f32.mrb[8].mxu1 }
 0x100   :  { %v3157_v44 = vpop.f32.mrb[9].mxu1 }
 0x103   :  { %v3159_v45 = vpop.f32.mrb[10].mxu1 }
 0x104   :  { %v3161_v46 = vpop.f32.mrb[11].mxu1 }
 0x127   :  { %v723_v8 = vpop.f32.mrb[0].mxu0 }
 0x128   :  { %v2684_v10 = vadd.f32 %v723_v8, %v154_v35  ;;  %v725_v11 = vpop.f32.mrb[1].mxu0  ;;  %v2121_v35 = vld [vmem:[%s3899_s3 + $0x1b8] sm:$0xff] }
 0x129   :  { %v2685_v14 = vadd.f32 %v725_v11, %v156_v36  ;;  %v2123_v36 = vld [vmem:[%s3899_s3 + $0x1c8] sm:$0xff] }
 0x12a   :  { %v3227_v19 = vadd.f32 %v2684_v10, %v3208_v5 }
 0x12b   :  { %v729_v21 = vpop.f32.mrb[2].mxu0  ;;  %v783_v29 = vadd.f32 %v2685_v14, %v3224_v18 }
 0x12c   :  { %v2686_v22 = vadd.f32 %v729_v21, %v160_v37  ;;  %806 = vrot.lane.b32.xlu0 %v3227_v19, %s2785_s17  ;;  %v731_v9 = vpop.f32.mrb[3].mxu0 }
 0x12d   :  { %v2687_v25 = vadd.f32 %v731_v9, %v162_v38  ;;  %v2499_v38 = vpack.c.bf16 %v2123_v36, %v2121_v35 }
 0x12e   :  { %v3245_v30 = vadd.f32 %v2686_v22, %v3208_v5 }
 0x12f   :  { %v735_v32 = vpop.f32.mrb[4].mxu0  ;;  %v785_v48 = vadd.f32 %v2687_v25, %v3224_v18  ;;  %2500 = vmatprep.subr.bf16.mxu1 %v2499_v38 }
 0x130   :  { %v2688_v33 = vadd.f32 %v735_v32, %v3147_v39  ;;  %808 = vrot.lane.b32.xlu0 %v783_v29, %s2785_s17  ;;  %810 = vrot.lane.b32.xlu1 %v3245_v30, %s2785_s17  ;;  %v737_v34 = vpop.f32.mrb[5].mxu0  ;;  %v2120_v39 = vld [vmem:[%s3899_s3 + $0x1b0] sm:$0xff] }
 0x131   :  { %v2689_v37 = vadd.f32 %v737_v34, %v3149_v40  ;;  %v2501_v50 = vpack.c.bf16 %v2122_v47, %v2120_v39  ;;  %v869_v29 = vld [vmem:[%s3899_s3 + $0x10] sm:$0xff] }
 0x132   :  { %v786_v49 = vadd.f32 %v2688_v33, %v3208_v5  ;;  %v874_v33 = vld [vmem:[%s3899_s3 + $0x38] sm:$0xff]  ;;  %v2505_v38 = vpack.c.bf16 %v869_v29, %v867_v28 }
 0x133   :  { %v741_v51 = vpop.f32.mrb[6].mxu0  ;;  %2502 = vmatpush1.bf16.msra.mxu1 %v2501_v50  ;;  %v787_v55 = vadd.f32 %v2689_v37, %v3224_v18  ;;  %v873_v50 = vld [vmem:[%s3899_s3 + $0x30] sm:$0xff] }
 0x134   :  { %v2690_v52 = vadd.f32 %v741_v51, %v3151_v41  ;;  %812 = vrot.lane.b32.xlu1 %v785_v48, %s2785_s17  ;;  %814 = vrot.lane.b32.xlu0 %v786_v49, %s2785_s17  ;;  %v743_v40 = vpop.f32.mrb[7].mxu0  ;;  %v868_v41 = vld [vmem:[%s3899_s3 + $0x8] sm:$0xff] }
 0x135   :  { %v2691_v54 = vadd.f32 %v743_v40, %v3153_v42  ;;  %974 = vmatprep.subr.mxu1 %v2125_v57  ;;  %v2124_v42 = vld [vmem:[%s3899_s3 + $0x1d0] sm:$0xff]  ;;  %v2503_v61 = vpack.c.bf16 %v870_v58, %v868_v41  ;;  %v876_v51 = vld [vmem:[%s3899_s3 + $0x48] sm:$0xff]  ;;  %v882_v41 = vld [vmem:[%s3899_s3 + $0x78] sm:$0xff] }
 0x136   :  { %v788_v56 = vadd.f32 %v2690_v52, %v3208_v5  ;;  %v878_v52 = vld [vmem:[%s3899_s3 + $0x58] sm:$0xff]  ;;  %v880_v57 = vld [vmem:[%s3899_s3 + $0x68] sm:$0xff] }
 0x137   :  { %v747_v59 = vpop.f32.mrb[8].mxu0  ;;  %975 = vmatpush1.msra.mxu1 %v2124_v42  ;;  %v789_v1 = vadd.f32 %v2691_v54, %v3224_v18  ;;  %v2511_v54 = vpack.c.bf16 %v878_v52, %v876_v51  ;;  %v879_v42 = vld [vmem:[%s3899_s3 + $0x60] sm:$0xff]  ;;  %v2140_v52 = vld [vmem:[%s3899_s3 + $0x230] sm:$0xff] }
 0x138   :  { %v2692_v62 = vadd.f32 %v747_v59, %v3155_v43  ;;  %816 = vrot.lane.b32.xlu1 %v787_v55, %s2785_s17  ;;  %818 = vrot.lane.b32.xlu0 %v788_v56, %s2785_s17  ;;  %v749_v63 = vpop.f32.mrb[9].mxu0  ;;  %v875_v55 = vld [vmem:[%s3899_s3 + $0x40] sm:$0xff]  ;;  %v2515_v59 = vpack.c.bf16 %v882_v41, %v880_v57  ;;  %v2144_v41 = vld [vmem:[%s3899_s3 + $0x250] sm:$0xff] }
 0x139   :  { %v2693_v0 = vadd.f32 %v749_v63, %v3157_v44  ;;  %2504 = vmatprep.subr.bf16.mxu1 %v2503_v61  ;;  %v881_v61 = vld [vmem:[%s3899_s3 + $0x70] sm:$0xff]  ;;  %v2138_v51 = vld [vmem:[%s3899_s3 + $0x220] sm:$0xff] }
 0x13a   :  { %v790_v2 = vadd.f32 %v2692_v62, %v3208_v5  ;;  %v884_v62 = vld [vmem:[%s3899_s3 + $0x88] sm:$0xff]  ;;  %v2142_v57 = vld [vmem:[%s3899_s3 + $0x240] sm:$0xff] }
 0x13b   :  { %v753_v3 = vpop.f32.mrb[10].mxu0  ;;  %v791_v10 = vadd.f32 %v2693_v0, %v3224_v18 }
 0x13c   :  { %v2694_v6 = vadd.f32 %v753_v3, %v3159_v45  ;;  %820 = vrot.lane.b32.xlu1 %v789_v1, %s2785_s17  ;;  %822 = vrot.lane.b32.xlu0 %v790_v2, %s2785_s17  ;;  %v755_v43 = vpop.f32.mrb[11].mxu0  ;;  %v886_v1 = vld [vmem:[%s3899_s3 + $0x98] sm:$0xff]  ;;  %v2517_v3 = vpack.c.bf16 %v881_v61, %v879_v42  ;;  %v2545_v42 = vpack.c.bf16 %v2144_v41, %v2142_v57  ;;  %v2185_v41 = vld [vmem:[%s3899_s3 + $0x388] sm:$0xff] }
 0x13d   :  { %v2695_v8 = vadd.f32 %v755_v43, %v3161_v46  ;;  %v2519_v43 = vpack.c.bf16 %v886_v1, %v884_v62  ;;  %v2146_v62 = vld [vmem:[%s3899_s3 + $0x260] sm:$0xff]  ;;  %v2153_v1 = vld [vmem:[%s3899_s3 + $0x298] sm:$0xff] }
 0x13e   :  { %v792_v44 = vadd.f32 %v2694_v6, %v3208_v5  ;;  %v2183_v57 = vld [vmem:[%s3899_s3 + $0x378] sm:$0xff] }
 0x13f   :  { %v793_v11 = vadd.f32 %v2695_v8, %v3224_v18  ;;  %v883_v8 = vld [vmem:[%s3899_s3 + $0x80] sm:$0xff] }
 0x140   :  { %824 = vrot.lane.b32.xlu1 %v791_v10, %s2785_s17  ;;  %826 = vrot.lane.b32.xlu0 %v792_v44, %s2785_s17  ;;  %v885_v10 = vld [vmem:[%s3899_s3 + $0x90] sm:$0xff] }
 0x144   :  { %828 = vrot.lane.b32.xlu1 %v793_v11, %s2785_s17  ;;  %v890_v11 = vld [vmem:[%s3899_s3 + $0xb8] sm:$0xff] }
 0x19e   :  { %v807_v45 = vpop.permute.xlu0 %806 }
 0x1a2   :  { %v809_v12 = vpop.permute.xlu0 %808  ;;  %v811_v13 = vpop.permute.xlu1 %810 }
 0x1a3   :  { %v831_v14 = vsel %vm830_vm4, %v807_v45, %v809_v12  ;;  %v2521_v45 = vpack.c.bf16 %v885_v10, %v883_v8  ;;  %v2155_v8 = vld [vmem:[%s3899_s3 + $0x2a8] sm:$0xff]  ;;  %v2157_v10 = vld [vmem:[%s3899_s3 + $0x2b8] sm:$0xff] }
 0x1a4   :  { %v843_v46 = vmax.f32 %v3227_v19, %v831_v14  ;;  %v889_v14 = vld [vmem:[%s3899_s3 + $0xb0] sm:$0xff] }
 0x1a6   :  { %850 = vst.msk [vmem:[#allocation2] sm:$0xff] %vm849_vm5, %v843_v46  ;;  %v813_v5 = vpop.permute.xlu1 %812  ;;  %v815_v15 = vpop.permute.xlu0 %814  ;;  %v892_v46 = vld [vmem:[%s3899_s3 + $0xc8] sm:$0xff] }
 0x1a7   :  { %v832_v16 = vsel %vm830_vm4, %v811_v13, %v813_v5  ;;  %v887_v13 = vld [vmem:[%s3899_s3 + $0xa0] sm:$0xff]  ;;  %v894_v5 = vld [vmem:[%s3899_s3 + $0xd8] sm:$0xff] }
 0x1a8   :  { %v844_v17 = vmax.f32 %v3245_v30, %v832_v16  ;;  %v872_v30 = vld [vmem:[%s3899_s3 + $0x28] sm:$0xff]  ;;  %v2527_v16 = vpack.c.bf16 %v894_v5, %v892_v46 }
 0x1a9   :  { %v2507_v48 = vpack.c.bf16 %v874_v33, %v872_v30  ;;  %v2137_v30 = vld [vmem:[%s3899_s3 + $0x218] sm:$0xff]  ;;  %v2159_v5 = vld [vmem:[%s3899_s3 + $0x2c8] sm:$0xff] }
 0x1aa   :  { %851 = vst.msk [vmem:[#allocation2 + $0x8] sm:$0xff] %vm849_vm5, %v844_v17  ;;  %v817_v18 = vpop.permute.xlu1 %816  ;;  %v819_v20 = vpop.permute.xlu0 %818  ;;  %v891_v17 = vld [vmem:[%s3899_s3 + $0xc0] sm:$0xff] }
 0x1ab   :  { %v833_v21 = vsel %vm830_vm4, %v815_v15, %v817_v18  ;;  %v2525_v15 = vpack.c.bf16 %v889_v14, %v887_v13  ;;  %v893_v18 = vld [vmem:[%s3899_s3 + $0xd0] sm:$0xff] }
 0x1ac   :  { %v845_v22 = vmax.f32 %v786_v49, %v833_v21  ;;  %v871_v49 = vld [vmem:[%s3899_s3 + $0x20] sm:$0xff] }
 0x1ad   :  { %v2509_v40 = vpack.c.bf16 %v873_v50, %v871_v49 }
 0x1ae   :  { %852 = vst.msk [vmem:[#allocation2 + $0x10] sm:$0xff] %vm849_vm5, %v845_v22  ;;  %v821_v9 = vpop.permute.xlu1 %820  ;;  %v823_v24 = vpop.permute.xlu0 %822 }
 0x1af   :  { %v834_v19 = vsel %vm830_vm4, %v819_v20, %v821_v9  ;;  %v2529_v20 = vpack.c.bf16 %v893_v18, %v891_v17  ;;  %v896_v9 = vld [vmem:[%s3899_s3 + $0xe8] sm:$0xff]  ;;  %v2162_v18 = vld [vmem:[%s3899_s3 + $0x2d0] sm:$0xff] }
 0x1b0   :  { %v846_v23 = vmax.f32 %v788_v56, %v834_v19  ;;  %v877_v56 = vld [vmem:[%s3899_s3 + $0x50] sm:$0xff]  ;;  %v2131_v19 = vld [vmem:[%s3899_s3 + $0x1e8] sm:$0xff] }
 0x1b1   :  { %v2513_v58 = vpack.c.bf16 %v877_v56, %v875_v55  ;;  %v856_v21 = vld [vmem:[#allocation2] ss:$2 sm:$0xff]  ;;  %v860_v22 = vld [vmem:[#allocation2 + $0x1] ss:$2 sm:$0xff]  ;;  %v2541_v55 = vpack.c.bf16 %v2140_v52, %v2138_v51  ;;  %v2179_v51 = vld [vmem:[%s3899_s3 + $0x358] sm:$0xff] }
 0x1b2   :  { %853 = vst.msk [vmem:[#allocation2 + $0x18] sm:$0xff] %vm849_vm5, %v846_v23  ;;  %v825_v25 = vpop.permute.xlu1 %824  ;;  %v827_v34 = vpop.permute.xlu0 %826  ;;  %v2133_v23 = vld [vmem:[%s3899_s3 + $0x1f8] sm:$0xff]  ;;  %v2181_v52 = vld [vmem:[%s3899_s3 + $0x368] sm:$0xff] }
 0x1b3   :  { %v835_v26 = vsel %vm830_vm4, %v823_v24, %v825_v25  ;;  %v863_v24 = vmax.f32 %v856_v21, %v860_v22  ;;  %v2130_v25 = vld [vmem:[%s3899_s3 + $0x1e0] sm:$0xff]  ;;  %v2167_v21 = vld [vmem:[%s3899_s3 + $0x2f8] sm:$0xff] }
 0x1b4   :  { %v847_v27 = vmax.f32 %v790_v2, %v835_v26  ;;  %v2132_v26 = vld [vmem:[%s3899_s3 + $0x1f0] sm:$0xff] }
 0x1b5   :  { %v898_v31 = vld [vmem:[#allocation2 + $0x2] ss:$2 sm:$0xff]  ;;  %v902_v32 = vld [vmem:[#allocation2 + $0x3] ss:$2 sm:$0xff]  ;;  %v2533_v33 = vpack.c.bf16 %v2132_v26, %v2130_v25 }
 0x1b6   :  { %854 = vst.msk [vmem:[#allocation2 + $0x20] sm:$0xff] %vm849_vm5, %v847_v27  ;;  %v829_v35 = vpop.permute.xlu1 %828  ;;  %v905_v36 = vmax.f32 %v898_v31, %v902_v32  ;;  %v2135_v27 = vld [vmem:[%s3899_s3 + $0x208] sm:$0xff]  ;;  %v895_v31 = vld [vmem:[%s3899_s3 + $0xe0] sm:$0xff]  ;;  %v2531_v32 = vpack.c.bf16 %v2133_v23, %v2131_v19 }
 0x1b7   :  { %v836_v37 = vsel %vm830_vm4, %v827_v34, %v829_v35  ;;  %v865_v34 = vmax.f32 %v863_v24, 0.0  ;;  %v1107_v14 = vld [vmem:[#allocation2 + $0x4] ss:$2 sm:$0xff]  ;;  %v1111_v46 = vld [vmem:[#allocation2 + $0x5] ss:$2 sm:$0xff] }
 0x1b8   :  { %v848_v39 = vmax.f32 %v792_v44, %v836_v37  ;;  %v907_v47 = vmax.f32 %v905_v36, 0.0  ;;  %v888_v44 = vld [vmem:[%s3899_s3 + $0xa8] sm:$0xff]  ;;  %v2535_v36 = vpack.c.bf16 %v2137_v30, %v2135_v27  ;;  %v2134_v37 = vld [vmem:[%s3899_s3 + $0x200] sm:$0xff]  ;;  %v1114_v17 = vmax.f32 %v1107_v14, %v1111_v46 }
 0x1b9   :  { %v2523_v12 = vpack.c.bf16 %v890_v11, %v888_v44  ;;  %v2555_v11 = vpack.c.bf16 %v2157_v10, %v2155_v8  ;;  %v2169_v19 = vld [vmem:[%s3899_s3 + $0x308] sm:$0xff]  ;;  %v2158_v23 = vld [vmem:[%s3899_s3 + $0x2c0] sm:$0xff]  ;;  %v2191_v10 = vld [vmem:[%s3899_s3 + $0x3b8] sm:$0xff] }
 0x1ba   :  { %855 = vst.msk [vmem:[#allocation2 + $0x28] sm:$0xff] %vm849_vm5, %v848_v39  ;;  %2126 = vmatmul.mubr.msk.f32.vlgmr.msra.gmra.mrb[12].mxu1 %vm849_vm5, %v907_v47  ;;  %v2139_v39 = vld [vmem:[%s3899_s3 + $0x228] sm:$0xff]  ;;  %v2141_v47 = vld [vmem:[%s3899_s3 + $0x238] sm:$0xff]  ;;  %v1116_v26 = vmax.f32 %v1114_v17, 0.0  ;;  %v2168_v30 = vld [vmem:[%s3899_s3 + $0x300] sm:$0xff] }
 0x1bb   :  { %2506 = vmatpush1.bf16.msra.mxu1 %v2505_v38  ;;  %1016 = vmatprep.mubr.f32.mxu1 %v2783_v7  ;;  %v2136_v38 = vld [vmem:[%s3899_s3 + $0x210] sm:$0xff]  ;;  %v2539_v50 = vpack.c.bf16 %v2141_v47, %v2139_v39  ;;  %v2177_v39 = vld [vmem:[%s3899_s3 + $0x348] sm:$0xff] }
 0x1bc   :  { %2508 = vmatprep.subr.bf16.mxu1 %v2507_v48  ;;  %v2537_v48 = vpack.c.bf16 %v2136_v38, %v2134_v37  ;;  %v2172_v37 = vld [vmem:[%s3899_s3 + $0x320] sm:$0xff]  ;;  %v2175_v38 = vld [vmem:[%s3899_s3 + $0x338] sm:$0xff]  ;;  %v2199_v14 = vld [vmem:[%s3899_s3 + $0x3e8] sm:$0xff] }
 0x1bd   :  { %v858_v28 = vld [vmem:[#allocation2 + $0x18] ss:$2 sm:$0xff]  ;;  %v862_v29 = vld [vmem:[#allocation2 + $0x19] ss:$2 sm:$0xff] }
 0x1be   :  { %v864_v35 = vmax.f32 %v858_v28, %v862_v29  ;;  %v2563_v28 = vpack.c.bf16 %v2169_v19, %v2167_v21  ;;  %v2166_v29 = vld [vmem:[%s3899_s3 + $0x2f0] sm:$0xff] }
 0x1bf   :  { %2510 = vmatpush1.bf16.msra.mxu1 %v2509_v40  ;;  %v2143_v40 = vld [vmem:[%s3899_s3 + $0x248] sm:$0xff]  ;;  %v2200_v19 = vld [vmem:[%s3899_s3 + $0x3f0] sm:$0xff] }
 0x1c0   :  { %2512 = vmatprep.subr.bf16.mxu1 %v2511_v54  ;;  %v866_v49 = vmax.f32 %v864_v35, 0.0  ;;  %v2145_v54 = vld [vmem:[%s3899_s3 + $0x258] sm:$0xff]  ;;  %v1241_v8 = vld [vmem:[#allocation2 + $0x7] ss:$2 sm:$0xff] }
 0x1c1   :  { %v900_v63 = vld [vmem:[#allocation2 + $0x1a] ss:$2 sm:$0xff]  ;;  %v904_v0 = vld [vmem:[#allocation2 + $0x1b] ss:$2 sm:$0xff]  ;;  %v2543_v56 = vpack.c.bf16 %v2145_v54, %v2143_v40  ;;  %v2575_v54 = vpack.c.bf16 %v2181_v52, %v2179_v51 }
 0x1c2   :  { %v906_v2 = vmax.f32 %v900_v63, %v904_v0  ;;  %v2148_v63 = vld [vmem:[%s3899_s3 + $0x270] sm:$0xff]  ;;  %v2151_v0 = vld [vmem:[%s3899_s3 + $0x288] sm:$0xff] }
 0x1c3   :  { %2514 = vmatpush1.bf16.msra.mxu1 %v2513_v58  ;;  %v2147_v58 = vld [vmem:[%s3899_s3 + $0x268] sm:$0xff] }
 0x1c4   :  { %2516 = vmatprep.subr.bf16.mxu1 %v2515_v59  ;;  %v908_v6 = vmax.f32 %v906_v2, 0.0  ;;  %v2149_v59 = vld [vmem:[%s3899_s3 + $0x278] sm:$0xff]  ;;  %v2549_v2 = vpack.c.bf16 %v2148_v63, %v2146_v62  ;;  %v2189_v63 = vld [vmem:[%s3899_s3 + $0x3a8] sm:$0xff] }
 0x1c5   :  { %v2547_v61 = vpack.c.bf16 %v2149_v59, %v2147_v58  ;;  %v1109_v22 = vld [vmem:[#allocation2 + $0x1c] ss:$2 sm:$0xff]  ;;  %v2579_v59 = vpack.c.bf16 %v2185_v41, %v2183_v57 }
 0x1c6   :  { %2127 = vmatmul.mubr.msk.f32.gmra.mrb[14].mxu1 %vm849_vm5, %v908_v6  ;;  %v2150_v6 = vld [vmem:[%s3899_s3 + $0x280] sm:$0xff]  ;;  %v2187_v62 = vld [vmem:[%s3899_s3 + $0x398] sm:$0xff] }
 0x1c7   :  { %2518 = vmatpush1.bf16.msra.mxu1 %v2517_v3  ;;  %1093 = vmatprep.mubr.f32.mxu1 %v2783_v7  ;;  %v2551_v3 = vpack.c.bf16 %v2153_v1, %v2151_v0  ;;  %v2583_v1 = vpack.c.bf16 %v2189_v63, %v2187_v62  ;;  %v1239_v46 = vld [vmem:[#allocation2 + $0x1e] ss:$2 sm:$0xff]  ;;  %v1371_v62 = vld [vmem:[#allocation2 + $0x9] ss:$2 sm:$0xff] }
 0x1c8   :  { %2520 = vmatprep.subr.bf16.mxu1 %v2519_v43  ;;  %v2152_v43 = vld [vmem:[%s3899_s3 + $0x290] sm:$0xff]  ;;  %v2223_v63 = vld [vmem:[%s3899_s3 + $0x4a8] sm:$0xff] }
 0x1c9   :  { %v2553_v44 = vpack.c.bf16 %v2152_v43, %v2150_v6  ;;  %v1237_v43 = vld [vmem:[#allocation2 + $0x6] ss:$2 sm:$0xff] }
 0x1cb   :  { %2522 = vmatpush1.bf16.msra.mxu1 %v2521_v45  ;;  %v2154_v45 = vld [vmem:[%s3899_s3 + $0x2a0] sm:$0xff] }
 0x1cc   :  { %2524 = vmatprep.subr.bf16.mxu1 %v2523_v12  ;;  %v2156_v12 = vld [vmem:[%s3899_s3 + $0x2b0] sm:$0xff] }
 0x1cd   :  { %v2557_v13 = vpack.c.bf16 %v2156_v12, %v2154_v45  ;;  %v1244_v45 = vmax.f32 %v1237_v43, %v1241_v8  ;;  %v2194_v12 = vld [vmem:[%s3899_s3 + $0x3c0] sm:$0xff] }
 0x1cf   :  { %2526 = vmatpush1.bf16.msra.mxu1 %v2525_v15  ;;  %v2163_v15 = vld [vmem:[%s3899_s3 + $0x2d8] sm:$0xff] }
 0x1d0   :  { %2528 = vmatprep.subr.bf16.mxu1 %v2527_v16  ;;  %v2165_v16 = vld [vmem:[%s3899_s3 + $0x2e8] sm:$0xff] }
 0x1d1   :  { %v2559_v24 = vpack.c.bf16 %v2165_v16, %v2163_v15  ;;  %v2201_v15 = vld [vmem:[%s3899_s3 + $0x3f8] sm:$0xff]  ;;  %v2190_v16 = vld [vmem:[%s3899_s3 + $0x3b0] sm:$0xff] }
 0x1d3   :  { %2530 = vmatpush1.bf16.msra.mxu1 %v2529_v20  ;;  %v2164_v20 = vld [vmem:[%s3899_s3 + $0x2e0] sm:$0xff] }
 0x1d4   :  { %1057 = vmatprep.subr.mxu1 %v896_v9  ;;  %v1113_v9 = vld [vmem:[#allocation2 + $0x1d] ss:$2 sm:$0xff]  ;;  %v2561_v25 = vpack.c.bf16 %v2164_v20, %v2162_v18  ;;  %v1246_v20 = vmax.f32 %v1244_v45, 0.0 }
 0x1d5   :  { %v1115_v27 = vmax.f32 %v1109_v22, %v1113_v9  ;;  %v2591_v22 = vpack.c.bf16 %v2201_v15, %v2199_v14  ;;  %v2198_v9 = vld [vmem:[%s3899_s3 + $0x3e0] sm:$0xff] }
 0x1d7   :  { %1058 = vmatpush1.msra.mxu1 %v895_v31  ;;  %v2171_v31 = vld [vmem:[%s3899_s3 + $0x318] sm:$0xff] }
 0x1d8   :  { %2128 = vmatmul.mubr.msk.f32.vlgmr.msra.gmra.mrb[12].mxu1 %vm849_vm5, %v865_v34  ;;  %2532 = vmatprep.subr.bf16.mxu1 %v2531_v32  ;;  %v2173_v32 = vld [vmem:[%s3899_s3 + $0x328] sm:$0xff]  ;;  %v1117_v34 = vmax.f32 %v1115_v27, 0.0 }
 0x1d9   :  { %2534 = vmatpush1.bf16.msra.mxu1 %v2533_v33  ;;  %1099 = vmatprep.mubr.f32.mxu1 %v2783_v7  ;;  %v2565_v33 = vpack.c.bf16 %v2168_v30, %v2166_v29  ;;  %v2567_v35 = vpack.c.bf16 %v2173_v32, %v2171_v31  ;;  %v2204_v29 = vld [vmem:[%s3899_s3 + $0x410] sm:$0xff]  ;;  %v2207_v30 = vld [vmem:[%s3899_s3 + $0x428] sm:$0xff]  ;;  %v2209_v31 = vld [vmem:[%s3899_s3 + $0x438] sm:$0xff] }
 0x1da   :  { %2536 = vmatprep.subr.bf16.mxu1 %v2535_v36  ;;  %v2170_v36 = vld [vmem:[%s3899_s3 + $0x310] sm:$0xff] }
 0x1db   :  { %v2569_v47 = vpack.c.bf16 %v2172_v37, %v2170_v36  ;;  %v2211_v36 = vld [vmem:[%s3899_s3 + $0x448] sm:$0xff]  ;;  %v2213_v37 = vld [vmem:[%s3899_s3 + $0x458] sm:$0xff] }
 0x1dc   :  { %2129 = vmatmul.mubr.msk.f32.gmra.mrb[14].mxu1 %vm849_vm5, %v866_v49  ;;  %v2174_v49 = vld [vmem:[%s3899_s3 + $0x330] sm:$0xff] }
 0x1dd   :  { %2538 = vmatpush1.bf16.msra.mxu1 %v2537_v48  ;;  %1219 = vmatprep.mubr.f32.mxu1 %v2783_v7  ;;  %v2571_v48 = vpack.c.bf16 %v2177_v39, %v2175_v38  ;;  %v2603_v39 = vpack.c.bf16 %v2213_v37, %v2211_v36  ;;  %v2258_v36 = vld [vmem:[%s3901_s5 + $0x138] sm:$0xff] }
 0x1de   :  { %2540 = vmatprep.subr.bf16.mxu1 %v2539_v50  ;;  %v2176_v50 = vld [vmem:[%s3899_s3 + $0x340] sm:$0xff] }
 0x1df   :  { %v2573_v40 = vpack.c.bf16 %v2176_v50, %v2174_v49  ;;  %v2215_v49 = vld [vmem:[%s3899_s3 + $0x468] sm:$0xff]  ;;  %v2217_v50 = vld [vmem:[%s3899_s3 + $0x478] sm:$0xff] }
 0x1e0   :  { %v2607_v52 = vpack.c.bf16 %v2217_v50, %v2215_v49 }
 0x1e1   :  { %2542 = vmatpush1.bf16.msra.mxu1 %v2541_v55  ;;  %v2178_v55 = vld [vmem:[%s3899_s3 + $0x350] sm:$0xff] }
 0x1e2   :  { %2544 = vmatprep.subr.bf16.mxu1 %v2543_v56  ;;  %v2180_v56 = vld [vmem:[%s3899_s3 + $0x360] sm:$0xff] }
 0x1e3   :  { %v2577_v58 = vpack.c.bf16 %v2180_v56, %v2178_v55  ;;  %v2219_v55 = vld [vmem:[%s3899_s3 + $0x488] sm:$0xff]  ;;  %v2221_v56 = vld [vmem:[%s3899_s3 + $0x498] sm:$0xff] }
 0x1e4   :  { %v2611_v41 = vpack.c.bf16 %v2221_v56, %v2219_v55 }
 0x1e5   :  { %2546 = vmatpush1.bf16.msra.mxu1 %v2545_v42  ;;  %v2182_v42 = vld [vmem:[%s3899_s3 + $0x370] sm:$0xff] }
 0x1e6   :  { %2548 = vmatprep.subr.bf16.mxu1 %v2547_v61  ;;  %v2184_v61 = vld [vmem:[%s3899_s3 + $0x380] sm:$0xff] }
 0x1e7   :  { %v2581_v0 = vpack.c.bf16 %v2184_v61, %v2182_v42  ;;  %v1367_v61 = vld [vmem:[#allocation2 + $0x8] ss:$2 sm:$0xff] }
 0x1e9   :  { %2550 = vmatpush1.bf16.msra.mxu1 %v2549_v2  ;;  %v2186_v2 = vld [vmem:[%s3899_s3 + $0x390] sm:$0xff] }
 0x1ea   :  { %2552 = vmatprep.subr.bf16.mxu1 %v2551_v3  ;;  %v2188_v3 = vld [vmem:[%s3899_s3 + $0x3a0] sm:$0xff] }
 0x1eb   :  { %v2585_v6 = vpack.c.bf16 %v2188_v3, %v2186_v2  ;;  %v1373_v2 = vld [vmem:[#allocation2 + $0x21] ss:$2 sm:$0xff] }
 0x1ec   :  { %v2222_v3 = vld [vmem:[%s3899_s3 + $0x4a0] sm:$0xff] }
 0x1ed   :  { %2554 = vmatpush1.bf16.msra.mxu1 %v2553_v44  ;;  %v2195_v44 = vld [vmem:[%s3899_s3 + $0x3c8] sm:$0xff] }
 0x1ee   :  { %2556 = vmatprep.subr.bf16.mxu1 %v2555_v11  ;;  %v2197_v11 = vld [vmem:[%s3899_s3 + $0x3d8] sm:$0xff] }
 0x1ef   :  { %v2587_v17 = vpack.c.bf16 %v2197_v11, %v2195_v44  ;;  %v2227_v44 = vld [vmem:[%s3901_s5 + $0x58] sm:$0xff]  ;;  %v2786_v11 = vmov 0.0|0.0  }
 0x1f0   :  { %2615 = vmatprep.subr.bf16.mxu0 %v2786_v11 }
 0x1f1   :  { %2558 = vmatpush1.bf16.msra.mxu1 %v2557_v13  ;;  %v2196_v13 = vld [vmem:[%s3899_s3 + $0x3d0] sm:$0xff] }
 0x1f2   :  { %1183 = vmatprep.subr.mxu1 %v2159_v5  ;;  %v1243_v5 = vld [vmem:[#allocation2 + $0x1f] ss:$2 sm:$0xff]  ;;  %v2589_v18 = vpack.c.bf16 %v2196_v13, %v2194_v12  ;;  %v2249_v12 = vld [vmem:[%s3901_s5 + $0xf0] sm:$0xff] }
 0x1f3   :  { %v1245_v21 = vmax.f32 %v1239_v46, %v1243_v5  ;;  %v2250_v13 = vld [vmem:[%s3901_s5 + $0xf8] sm:$0xff]  ;;  %v2228_v46 = vld [vmem:[%s3901_s5 + $0x60] sm:$0xff]  ;;  %v2229_v5 = vld [vmem:[%s3901_s5 + $0x68] sm:$0xff] }
 0x1f4   :  { %v2661_v14 = vpack.c.bf16 %v2250_v13, %v2249_v12  ;;  %v2619_v15 = vpack.c.bf16 %v2229_v5, %v2228_v46  ;;  %v1545_v13 = vld [vmem:[%s3901_s5 + $0x30] sm:$0xff]  ;;  %v1547_v5 = vld [vmem:[%s3901_s5 + $0x40] sm:$0xff] }
 0x1f5   :  { %1184 = vmatpush1.msra.mxu1 %v2158_v23  ;;  %v2203_v23 = vld [vmem:[%s3899_s3 + $0x408] sm:$0xff] }
 0x1f6   :  { %2160 = vmatmul.mubr.msk.f32.vlgmr.msra.gmra.mrb[12].mxu1 %vm849_vm5, %v1116_v26  ;;  %2560 = vmatprep.subr.bf16.mxu1 %v2559_v24  ;;  %v2205_v24 = vld [vmem:[%s3899_s3 + $0x418] sm:$0xff]  ;;  %v1247_v26 = vmax.f32 %v1245_v21, 0.0  ;;  %v2230_v21 = vld [vmem:[%s3901_s5 + $0x70] sm:$0xff] }
 0x1f7   :  { %2562 = vmatpush1.bf16.msra.mxu1 %v2561_v25  ;;  %1225 = vmatprep.mubr.f32.mxu1 %v2783_v7  ;;  %v2593_v25 = vpack.c.bf16 %v2200_v19, %v2198_v9  ;;  %v2595_v27 = vpack.c.bf16 %v2205_v24, %v2203_v23  ;;  %v2253_v23 = vld [vmem:[%s3901_s5 + $0x110] sm:$0xff]  ;;  %v2254_v24 = vld [vmem:[%s3901_s5 + $0x118] sm:$0xff] }
 0x1f8   :  { %2564 = vmatprep.subr.bf16.mxu1 %v2563_v28  ;;  %v2202_v28 = vld [vmem:[%s3899_s3 + $0x400] sm:$0xff] }
 0x1f9   :  { %v2597_v32 = vpack.c.bf16 %v2204_v29, %v2202_v28  ;;  %v2255_v28 = vld [vmem:[%s3901_s5 + $0x120] sm:$0xff] }
 0x1fa   :  { %2161 = vmatmul.mubr.msk.f32.gmra.mrb[14].mxu1 %vm849_vm5, %v1117_v34  ;;  %v2206_v34 = vld [vmem:[%s3899_s3 + $0x420] sm:$0xff] }
 0x1fb   :  { %2566 = vmatpush1.bf16.msra.mxu1 %v2565_v33  ;;  %1349 = vmatprep.mubr.f32.mxu1 %v2783_v7  ;;  %v2599_v33 = vpack.c.bf16 %v2209_v31, %v2207_v30  ;;  %v2670_v30 = vpack.c.bf16 %v2256_v53, %v2255_v28  ;;  %v2234_v31 = vld [vmem:[%s3901_s5 + $0x90] sm:$0xff] }
 0x1fc   :  { %2568 = vmatprep.subr.bf16.mxu1 %v2567_v35  ;;  %v2208_v35 = vld [vmem:[%s3899_s3 + $0x430] sm:$0xff] }
 0x1fd   :  { %v2601_v38 = vpack.c.bf16 %v2208_v35, %v2206_v34  ;;  %v2257_v35 = vld [vmem:[%s3901_s5 + $0x130] sm:$0xff] }
 0x1fe   :  { %v2244_v28 = vld [vmem:[%s3901_s5 + $0xd0] sm:$0xff] }
 0x1ff   :  { %2570 = vmatpush1.bf16.msra.mxu1 %v2569_v47  ;;  %v2210_v47 = vld [vmem:[%s3899_s3 + $0x440] sm:$0xff] }
 0x200   :  { %2572 = vmatprep.subr.bf16.mxu1 %v2571_v48  ;;  %v2212_v48 = vld [vmem:[%s3899_s3 + $0x450] sm:$0xff] }
 0x201   :  { %v2605_v51 = vpack.c.bf16 %v2212_v48, %v2210_v47  ;;  %v2673_v47 = vpack.c.bf16 %v2258_v36, %v2257_v35  ;;  %v1903_v36 = vld [vmem:[%s3903_s7] sm:$0xff] }
 0x203   :  { %2574 = vmatpush1.bf16.msra.mxu1 %v2573_v40  ;;  %v2214_v40 = vld [vmem:[%s3899_s3 + $0x460] sm:$0xff] }
 0x204   :  { %2576 = vmatprep.subr.bf16.mxu1 %v2575_v54  ;;  %v2216_v54 = vld [vmem:[%s3899_s3 + $0x470] sm:$0xff] }
 0x205   :  { %v2609_v57 = vpack.c.bf16 %v2216_v54, %v2214_v40 }
 0x207   :  { %2578 = vmatpush1.bf16.msra.mxu1 %v2577_v58  ;;  %v2218_v58 = vld [vmem:[%s3899_s3 + $0x480] sm:$0xff] }
 0x208   :  { %2580 = vmatprep.subr.bf16.mxu1 %v2579_v59  ;;  %v2220_v59 = vld [vmem:[%s3899_s3 + $0x490] sm:$0xff] }
 0x209   :  { %v2613_v42 = vpack.c.bf16 %v2220_v59, %v2218_v58  ;;  %v1539_v58 = vld [vmem:[%s3901_s5] sm:$0xff]  ;;  %v1540_v59 = vld [vmem:[%s3901_s5 + $0x8] sm:$0xff] }
 0x20b   :  { %2582 = vmatpush1.bf16.msra.mxu1 %v2581_v0  ;;  %v1374_v0 = vmax.f32 %v1367_v61, %v1371_v62 }
 0x20c   :  { %2584 = vmatprep.subr.bf16.mxu1 %v2583_v1  ;;  %v1369_v1 = vld [vmem:[#allocation2 + $0x20] ss:$2 sm:$0xff] }
 0x20d   :  { %v1375_v43 = vmax.f32 %v1369_v1, %v1373_v2  ;;  %v2631_v1 = vpack.c.bf16 %v1540_v59, %v1539_v58 }
 0x20f   :  { %2586 = vmatpush1.bf16.msra.mxu1 %v2585_v6  ;;  %v1376_v6 = vmax.f32 %v1374_v0, 0.0  ;;  %v1377_v8 = vmax.f32 %v1375_v43, 0.0  ;;  %v1542_v43 = vld [vmem:[%s3901_s5 + $0x18] sm:$0xff] }
 0x210   :  { %1313 = vmatprep.subr.mxu1 %v2191_v10  ;;  %v2226_v10 = vld [vmem:[%s3901_s5 + $0x50] sm:$0xff] }
 0x211   :  { %v2616_v45 = vpack.c.bf16 %v2227_v44, %v2226_v10  ;;  %v1543_v44 = vld [vmem:[%s3901_s5 + $0x20] sm:$0xff] }
 0x213   :  { %1314 = vmatpush1.msra.mxu1 %v2190_v16  ;;  %2617 = vmatpush3.bf16.msra.mxu0 %v2616_v45  ;;  %v2251_v16 = vld [vmem:[%s3901_s5 + $0x100] sm:$0xff]  ;;  %v1544_v45 = vld [vmem:[%s3901_s5 + $0x28] sm:$0xff] }
 0x214   :  { %2192 = vmatmul.mubr.msk.f32.vlgmr.msra.gmra.mrb[12].mxu1 %vm849_vm5, %v1246_v20  ;;  %2588 = vmatprep.subr.bf16.mxu1 %v2587_v17  ;;  %v2252_v17 = vld [vmem:[%s3901_s5 + $0x108] sm:$0xff]  ;;  %v2637_v12 = vpack.c.bf16 %v1544_v45, %v1543_v44 }
 0x215   :  { %2590 = vmatpush1.bf16.msra.mxu1 %v2589_v18  ;;  %1355 = vmatprep.mubr.f32.mxu1 %v2783_v7  ;;  %v1496_v18 = vld [vmem:[%s3900_s4] sm:$0x3]  ;;  %v2664_v20 = vpack.c.bf16 %v2252_v17, %v2251_v16 }
 0x216   :  { %2592 = vmatprep.subr.bf16.mxu1 %v2591_v22  ;;  %2618 = vmatprep.subr.bf16.mxu0 %v2786_v11  ;;  %v2231_v22 = vld [vmem:[%s3901_s5 + $0x78] sm:$0xff]  ;;  %v1501_v9 = vrot.slane %v1496_v18, %v774_v60  ;;  %v2233_v60 = vld [vmem:[%s3901_s5 + $0x88] sm:$0xff] }
 0x217   :  { %2620 = vmatpush3.bf16.msra.mxu0 %v2619_v15  ;;  %v2622_v19 = vpack.c.bf16 %v2231_v22, %v2230_v21  ;;  %v1548_v15 = vld [vmem:[%s3901_s5 + $0x48] sm:$0xff]  ;;  %v2238_v21 = vld [vmem:[%s3901_s5 + $0xa0] sm:$0xff] }
 0x218   :  { %2193 = vmatmul.mubr.msk.f32.gmra.mrb[14].mxu1 %vm849_vm5, %v1247_v26  ;;  %2621 = vmatprep.subr.bf16.mxu0 %v2786_v11  ;;  %v2667_v26 = vpack.c.bf16 %v2254_v24, %v2253_v23  ;;  %v2239_v22 = vld [vmem:[%s3901_s5 + $0xa8] sm:$0xff]  ;;  %v2240_v23 = vld [vmem:[%s3901_s5 + $0xb0] sm:$0xff]  ;;  %v2241_v24 = vld [vmem:[%s3901_s5 + $0xb8] sm:$0xff] }
 0x219   :  { %2594 = vmatpush1.bf16.msra.mxu1 %v2593_v25  ;;  %1479 = vmatprep.mubr.f32.mxu1 %v2783_v7  ;;  %v1505_v25 = vrot.slane %v1496_v18, %v778_v4  ;;  %v2643_v18 = vpack.c.bf16 %v1548_v15, %v1547_v5 }
 0x21a   :  { %2596 = vmatprep.subr.bf16.mxu1 %v2595_v27  ;;  %v2232_v27 = vld [vmem:[%s3901_s5 + $0x80] sm:$0xff] }
 0x21b   :  { %2623 = vmatpush3.bf16.msra.mxu0 %v2622_v19  ;;  %v2625_v29 = vpack.c.bf16 %v2233_v60, %v2232_v27  ;;  %v2243_v27 = vld [vmem:[%s3901_s5 + $0xc8] sm:$0xff] }
 0x21c   :  { %2624 = vmatprep.subr.bf16.mxu0 %v2786_v11 }
 0x21d   :  { %2598 = vmatpush1.bf16.msra.mxu1 %v2597_v32  ;;  %v2235_v32 = vld [vmem:[%s3901_s5 + $0x98] sm:$0xff] }
 0x21e   :  { %2600 = vmatprep.subr.bf16.mxu1 %v2599_v33 }
 0x21f   :  { %2626 = vmatpush3.bf16.msra.mxu0 %v2625_v29  ;;  %v2245_v29 = vld [vmem:[%s3901_s5 + $0xd8] sm:$0xff] }
 0x220   :  { %2627 = vmatprep.subr.bf16.mxu0 %v2786_v11  ;;  %v2655_v53 = vpack.c.bf16 %v2245_v29, %v2244_v28 }
 0x221   :  { %2602 = vmatpush1.bf16.msra.mxu1 %v2601_v38  ;;  %v2628_v38 = vpack.c.bf16 %v2235_v32, %v2234_v31 }
 0x222   :  { %2604 = vmatprep.subr.bf16.mxu1 %v2603_v39 }
 0x223   :  { %2629 = vmatpush3.bf16.msra.mxu0 %v2628_v38 }
 0x224   :  { %2630 = vmatprep.subr.bf16.mxu0 %v2786_v11 }
 0x225   :  { %2606 = vmatpush1.bf16.msra.mxu1 %v2605_v51 }
 0x226   :  { %2608 = vmatprep.subr.bf16.mxu1 %v2607_v52 }
 0x229   :  { %2610 = vmatpush1.bf16.msra.mxu1 %v2609_v57 }
 0x22a   :  { %2612 = vmatprep.subr.bf16.mxu1 %v2611_v41 }
 0x22d   :  { %2614 = vmatpush1.bf16.msra.mxu1 %v2613_v42 }
 0x22e   :  { %1443 = vmatprep.subr.mxu1 %v2223_v63 }
 0x231   :  { %1444 = vmatpush1.msra.mxu1 %v2222_v3 }
 0x232   :  { %2224 = vmatmul.mubr.msk.f32.vlgmr.msra.gmra.mrb[12].mxu1 %vm849_vm5, %v1376_v6  ;;  %2660 = vmatprep.subr.bf16.mxu1 %v2786_v11  ;;  %v1541_v6 = vld [vmem:[%s3901_s5 + $0x10] sm:$0xff] }
 0x233   :  { %1485 = vmatprep.mubr.f32.mxu1 %v2783_v7  ;;  %2662 = vmatpush3.bf16.msra.mxu1 %v2661_v14  ;;  %v2634_v10 = vpack.c.bf16 %v1542_v43, %v1541_v6  ;;  %v1546_v14 = vld [vmem:[%s3901_s5 + $0x38] sm:$0xff] }
 0x234   :  { %2663 = vmatprep.subr.bf16.mxu1 %v2786_v11  ;;  %v2640_v46 = vpack.c.bf16 %v1546_v14, %v1545_v13 }
 0x236   :  { %2225 = vmatmul.mubr.msk.f32.gmra.mrb[14].mxu1 %vm849_vm5, %v1377_v8 }
 0x237   :  { %2665 = vmatpush3.bf16.msra.mxu1 %v2664_v20  ;;  %2405 = vmatprep.mubr.msk.f32.mxu1 %vm2787_vm6, %v2783_v7 }
 0x238   :  { %2666 = vmatprep.subr.bf16.mxu1 %v2786_v11 }
 0x23b   :  { %2668 = vmatpush3.bf16.msra.mxu1 %v2667_v26  ;;  %v2242_v26 = vld [vmem:[%s3901_s5 + $0xc0] sm:$0xff] }
 0x23c   :  { %2669 = vmatprep.subr.bf16.mxu1 %v2786_v11  ;;  %v2652_v60 = vpack.c.bf16 %v2243_v27, %v2242_v26 }
 0x23f   :  { %2671 = vmatpush3.bf16.msra.mxu1 %v2670_v30  ;;  %v2247_v30 = vld [vmem:[%s3901_s5 + $0xe8] sm:$0xff] }
 0x240   :  { %2672 = vmatprep.subr.bf16.mxu1 %v2786_v11 }
 0x243   :  { %2674 = vmatpush3.bf16.msra.mxu1 %v2673_v47  ;;  %v1906_v47 = vld [vmem:[%s3903_s7 + $0x18] sm:$0xff] }
 0x305   :  { %v1481_v4 = vpop.f32.mrb[12].mxu1 }
 0x306   :  { %v1508_v33 = vadd.f32 %v1501_v9, %v1481_v4  ;;  %v1483_v34 = vpop.f32.mrb[13].mxu1  ;;  %v2246_v4 = vld [vmem:[%s3901_s5 + $0xe0] sm:$0xff] }
 0x307   :  { %v1509_v37 = vadd.f32 %v1505_v25, %v1483_v34 }
 0x308   :  { %1516 = vrot.lane.b32.xlu0 %v1508_v33, %s2788_s28 }
 0x309   :  { %1518 = vrot.lane.b32.xlu1 %v1509_v37, %s2788_s28  ;;  %v1487_v39 = vpop.f32.mrb[14].mxu1  ;;  %v1904_v37 = vld [vmem:[%s3903_s7 + $0x8] sm:$0xff] }
 0x30a   :  { %v1510_v48 = vadd.f32 %v1501_v9, %v1487_v39  ;;  %v1489_v49 = vpop.f32.mrb[15].mxu1  ;;  %v2646_v9 = vpack.c.bf16 %v2239_v22, %v2238_v21  ;;  %v2676_v38 = vpack.c.bf16 %v1904_v37, %v1903_v36  ;;  %v1905_v39 = vld [vmem:[%s3903_s7 + $0x10] sm:$0xff] }
 0x30b   :  { %v1511_v50 = vadd.f32 %v1505_v25, %v1489_v49  ;;  %v2649_v25 = vpack.c.bf16 %v2241_v24, %v2240_v23  ;;  %v1907_v49 = vld [vmem:[%s3903_s7 + $0x20] sm:$0xff] }
 0x30c   :  { %1520 = vrot.lane.b32.xlu0 %v1510_v48, %s2788_s28 }
 0x30d   :  { %1522 = vrot.lane.b32.xlu1 %v1511_v50, %s2788_s28  ;;  %v1908_v50 = vld [vmem:[%s3903_s7 + $0x28] sm:$0xff] }
 0x37a   :  { %v1517_v51 = vpop.permute.xlu0 %1516 }
 0x37b   :  { %v1519_v52 = vpop.permute.xlu1 %1518 }
 0x37c   :  { %v1525_v40 = vsel %vm1524_vm7, %v1517_v51, %v1519_v52  ;;  %v2682_v51 = vpack.c.bf16 %v1908_v50, %v1907_v49  ;;  %v1909_v52 = vld [vmem:[%s3903_s7 + $0x30] sm:$0x3] }
 0x37d   :  { %v1529_v54 = vmax.f32 %v1508_v33, %v1525_v40  ;;  %v2658_v33 = vpack.c.bf16 %v2247_v30, %v2246_v4 }
 0x37e   :  { %v1521_v55 = vpop.permute.xlu0 %1520 }
 0x37f   :  { %1532 = vst.msk [vmem:[#allocation3] sm:$0xff] %vm1531_vm8, %v1529_v54  ;;  %v1523_v56 = vpop.permute.xlu1 %1522 }
 0x380   :  { %v1526_v57 = vsel %vm1524_vm7, %v1521_v55, %v1523_v56 }
 0x381   :  { %v1530_v41 = vmax.f32 %v1510_v48, %v1526_v57  ;;  %v2679_v48 = vpack.c.bf16 %v1906_v47, %v1905_v39 }
 0x383   :  { %1533 = vst.msk [vmem:[#allocation3 + $0x8] sm:$0xff] %vm1531_vm8, %v1530_v41 }
 0x38a   :  { %v1550_v42 = vld [vmem:[#allocation3 + $0x2] ss:$8 sm:$0x3]  ;;  %v1552_v61 = vld [vmem:[#allocation3 + $0x3] ss:$8 sm:$0x3] }
 0x38b   :  { %v1553_v62 = vmax.f32 %v1550_v42, %v1552_v61  ;;  %v1804_v63 = vld [vmem:[#allocation3 + $0x6] ss:$8 sm:$0x3]  ;;  %v1806_v0 = vld [vmem:[#allocation3 + $0x7] ss:$8 sm:$0x3] }
 0x38c   :  { %v1807_v2 = vmax.f32 %v1804_v63, %v1806_v0  ;;  %v1534_v16 = vld [vmem:[#allocation3] ss:$8 sm:$0x3]  ;;  %v1536_v17 = vld [vmem:[#allocation3 + $0x1] ss:$8 sm:$0x3] }
 0x38d   :  { %v1554_v3 = vmax.f32 %v1553_v62, 0.0  ;;  %v1537_v20 = vmax.f32 %v1534_v16, %v1536_v17  ;;  %v1713_v31 = vld [vmem:[#allocation3 + $0x4] ss:$8 sm:$0x3]  ;;  %v2261_v0 = vld [vmem:[%s3904_s8] ss:$0 sm:$0xff] }
 0x38e   :  { %v1808_v8 = vmax.f32 %v1807_v2, 0.0  ;;  %v1715_v32 = vld [vmem:[#allocation3 + $0x5] ss:$8 sm:$0x3] }
 0x38f   :  { %2337 = vmatmul.mubr.msk.f32.vlgmr.msra.gmra.mrb[12].mxu0 %vm1531_vm8, %v1554_v3  ;;  %v1538_v19 = vmax.f32 %v1537_v20, 0.0  ;;  %v1716_v34 = vmax.f32 %v1713_v31, %v1715_v32 }
 0x390   :  { %2632 = vmatpush3.bf16.msra.mxu0 %v2631_v1  ;;  %2406 = vmatmul.mubr.msk.f32.vlgmr.msra.gmra.mrb[16].mxu1 %vm1531_vm8, %v1808_v8 }
 0x391   :  { %2633 = vmatprep.subr.bf16.mxu0 %v2786_v11  ;;  %2359 = vmatprep.mubr.msk.f32.mxu0 %vm2787_vm6, %v2783_v7  ;;  %v1717_v35 = vmax.f32 %v1716_v34, 0.0 }
 0x394   :  { %2635 = vmatpush3.bf16.msra.mxu0 %v2634_v10 }
 0x395   :  { %2636 = vmatprep.subr.bf16.mxu0 %v2786_v11 }
 0x398   :  { %2638 = vmatpush3.bf16.msra.mxu0 %v2637_v12 }
 0x399   :  { %2639 = vmatprep.subr.bf16.mxu0 %v2786_v11 }
 0x39c   :  { %2641 = vmatpush3.bf16.msra.mxu0 %v2640_v46 }
 0x39d   :  { %2642 = vmatprep.subr.bf16.mxu0 %v2786_v11 }
 0x3a0   :  { %2644 = vmatpush3.bf16.msra.mxu0 %v2643_v18 }
 0x3a1   :  { %2645 = vmatprep.subr.bf16.mxu0 %v2786_v11 }
 0x3a3   :  { %2360 = vmatmul.mubr.msk.f32.vlgmr.msra.gmra.mrb[14].mxu0 %vm1531_vm8, %v1538_v19 }
 0x3a4   :  { %2647 = vmatpush3.bf16.msra.mxu0 %v2646_v9  ;;  %2382 = vmatprep.mubr.msk.f32.mxu0 %vm2787_vm6, %v2783_v7 }
 0x3a5   :  { %2648 = vmatprep.subr.bf16.mxu0 %v2786_v11 }
 0x3a8   :  { %2650 = vmatpush3.bf16.msra.mxu0 %v2649_v25 }
 0x3a9   :  { %2651 = vmatprep.subr.bf16.mxu0 %v2786_v11 }
 0x3ac   :  { %2653 = vmatpush3.bf16.msra.mxu0 %v2652_v60 }
 0x3ad   :  { %2654 = vmatprep.subr.bf16.mxu0 %v2786_v11 }
 0x3b0   :  { %2656 = vmatpush3.bf16.msra.mxu0 %v2655_v53 }
 0x3b1   :  { %2657 = vmatprep.subr.bf16.mxu0 %v2786_v11 }
 0x3b4   :  { %2659 = vmatpush3.bf16.msra.mxu0 %v2658_v33 }
 0x3b5   :  { %2675 = vmatprep.subr.bf16.mxu0 %v2786_v11 }
 0x3b7   :  { %2383 = vmatmul.mubr.msk.f32.vlgmr.msra.gmra.mrb[16].mxu0 %vm1531_vm8, %v1717_v35 }
 0x3b8   :  { %2422 = vmatprep.mubr.msk.f32.mxu0 %vm2787_vm6, %v2783_v7  ;;  %2677 = vmatpush3.bf16.msra.mxu0 %v2676_v38 }
 0x3b9   :  { %2678 = vmatprep.subr.bf16.mxu0 %v2786_v11 }
 0x3bc   :  { %2680 = vmatpush3.bf16.msra.mxu0 %v2679_v48 }
 0x3bd   :  { %2681 = vmatprep.subr.bf16.mxu0 %v2786_v11 }
 0x3c0   :  { %2683 = vmatpush3.bf16.msra.mxu0 %v2682_v51 }
 0x3c1   :  { %2420 = vmatprep.subr.mxu0 %v2783_v7  ;;  %v2260_v7 = vld [vmem:[%s3902_s6] ss:$0 sm:$0xff]  ;;  %s2789_s6 = smov [#allocation4]  }
 0x3c2   :  { %s2016_s8 = sshll.u32 %s2789_s6, 4  ;;  %s2017_s8 = int_to_ptr.vmem [resolvable:$true] %s2016_s8 }
 0x3c3   :  { %s2759_s10 = scalar_lea.vmem %s2017_s8, 32  ;;  %p2764_p1 = scmp.lt.s32.totalorder %s2017_s8, %s2017_s8 }
 0x3c4   :  { %2421 = vmatpush3.msk.msra.mxu0 %vm1921_vm9, %v1909_v52  ;;  %p2760_p0 = scmp.ne.s32.totalorder %s2017_s8, %s2759_s10  ;;  %p2765_p2 = scmp.lt.s32.totalorder %s2759_s10, %s2759_s10 }
 0x3c6   :  { %p2766_p3 = por %p2765_p2, %p2764_p1 }
 0x3c8   :  { %p2767_p4 = pnand %p2766_p3, %p2760_p0 }
 0x462   :  { %v1635_v40 = vpop.f32.mrb[12].mxu0 }
 0x463   :  { %v1889_v11 = vpop.f32.mrb[16].mxu1  ;;  %v2338_v54 = vpop.f32.mrb[13].mxu0 }
 0x464   :  { %v2407_v55 = vpop.f32.mrb[17].mxu1 }
 0x476   :  { %v1708_v56 = vpop.f32.mrb[14].mxu0 }
 0x477   :  { %v1709_v57 = vadd.f32 %v1708_v56, %v1635_v40  ;;  %v2361_v41 = vpop.f32.mrb[15].mxu0 }
 0x48a   :  { %v1798_v58 = vpop.f32.mrb[16].mxu0 }
 0x48b   :  { %v1802_v59 = vadd.f32 %v1798_v58, %v1709_v57  ;;  %v2384_v42 = vpop.f32.mrb[17].mxu0 }
 0x48d   :  { %v1893_v61 = vadd.f32 %v1889_v11, %v1802_v59 }
 0x48f   :  { %v1901_v62 = vadd.f32 %v2260_v7, %v1893_v61 }
 0x491   :  { %v1902_v63 = vmax.f32 %v1901_v62, 0.0 }
 0x493   :  { %2423 = vmatmul.mubr.msk.f32.vlgmr.msra.gmra.mrb[18].mxu0 %vm1917_vm10, %v1902_v63 }
 0x566   :  { %v1991_v1 = vpop.f32.mrb[18].mxu0 }
 0x567   :  { %v1992_v2 = vadd.f32 %v2261_v0, %v1991_v1  ;;  %v2424_v3 = vpop.f32.mrb[19].mxu0 }
 0x569   :  { %v1996_v6 = vsel %vm1995_vm11, %v1992_v2, -inf }
 0x56a   :  { %1997 = vmax.xlane.f32.xlu0 %v1996_v6 }
 0x5f7   :  { %v1998_v43 = vpop.xlane.xlu0 %1997 }
 0x5f8   :  { %v1999_v8 = vsub.f32 %v1992_v2, %v1998_v43 }
 0x5fa   :  { %v2000_v10 = vmul.f32 1.442695, %v1999_v8 }
 0x5fc   :  { %2755 = vpow2.f32 %v2000_v10 }
 0x606   :  { %v2756_v44 = vpop.eup %2755 }
 0x607   :  { %v2002_v45 = vsel %vm1995_vm11, %v2756_v44, 0.0 }
 0x608   :  { %2003 = vadd.xlane.f32.xlu1 %v2002_v45 }
 0x695   :  { %v2004_v12 = vpop.xlane.xlu1 %2003 }
 0x696   :  { %2757 = vlog2.f32 %v2004_v12 }
 0x6a0   :  { %v2758_v13 = vpop.eup %2757 }
 0x6a1   :  { %v2006_v14 = vmul.f32 0.6931472, %v2758_v13 }
 0x6a3   :  { %v2007_v46 = vadd.f32 %v2006_v14, %v1998_v43 }
 0x6a5   :  { %v2008_v5 = vsub.f32 %v1992_v2, %v2007_v46 }
 0x6a7   :  { %2009 = vst.msk [vmem:[#allocation4] sm:$0x3] %vm1995_vm11, %v2008_v5 }
 0x6a8   :  { %2770 = shalt.err (!%p2767_p4)
}
 0x6a9   :  { %s2771_s12 = scalar_lea.hbm %s3905_s9, 32 }
 0x6aa   :  { %p2772_p5 = scmp.ne.s32.totalorder %s3905_s9, %s2771_s12  ;;  %p2775_p6 = scmp.lt.u32.totalorder %s2771_s12, %s3905_s9 }
 0x6ac   :  { %p2777_p7 = pnand %p2775_p6, %p2772_p5 }
 0x6ae   :  { %2780 = shalt.err (!%p2777_p7)
}
 0x6af   :  { %2019 = dma.vmem_to_hbm [thread:$0]  %s2017_s8, 32, %s3905_s9, [#allocation5]  }
 0x6b0   :  { %2781 = dma.done.wait [#allocation5], 32  }
 0x6b1   :  { %2782 = vsyncadd [#allocation5], 4294967264 }
 0x6b2   :  { %2023 = vsyncpa [#allocation5], 1 }

</bundles_post_ra>
